<compile_context>
chip_gen: v7x
topology: tpu7x:2x2x1
jax: 0.10.0
libtpu: 0.0.40
codegen_flags: <defaults>
</compile_context>

<pallas_src>
import functools

import jax
import jax.numpy as jnp
from jax.experimental import pallas as pl
from jax.experimental.pallas import tpu as pltpu


# ----------------------------------------------------------------------------
# In-kernel helpers (f32 math)
# ----------------------------------------------------------------------------
def _layernorm(x, gamma, beta, eps=1e-5):
    # x: (N, D), gamma/beta: (1, D)   (torch.nn.LayerNorm semantics)
    mu = jnp.mean(x, axis=-1, keepdims=True)
    var = jnp.mean((x - mu) ** 2, axis=-1, keepdims=True)
    return (x - mu) * jax.lax.rsqrt(var + eps) * gamma + beta


def _softmax_last(x):
    x = x - jnp.max(x, axis=-1, keepdims=True)
    e = jnp.exp(x)
    # Reciprocal goes to the EUP slot instead of a VALU divide.
    return e * pl.reciprocal(jnp.sum(e, axis=-1, keepdims=True), approx=True)


# ----------------------------------------------------------------------------
# Whole-stack kernel: grid = (batch, layer); activations resident in VMEM.
# ----------------------------------------------------------------------------
def transformer_stack_kernel(
    x_ref,        # (1, N, D)        f32   (index depends on batch only)
    ln1_g_ref,    # (1, 1, D)        f32   (per-layer, streamed)
    ln1_b_ref,    # (1, 1, D)
    wqkv_ref,     # (1, D, 3*H*Dh)   bf16
    wo_ref,       # (1, H*Dh, D)     bf16
    bo_ref,       # (1, 1, D)
    ln2_g_ref,    # (1, 1, D)
    ln2_b_ref,    # (1, 1, D)
    w1_ref,       # (1, D, mlp)      bf16
    b1_ref,       # (1, 1, mlp)
    w2_ref,       # (1, mlp, D)      bf16
    b2_ref,       # (1, 1, D)
    head_wh_ref,  # (D, hid)         bf16  (constant over grid)
    head_bh_ref,  # (1, hid)
    head_wo_ref,  # (hid, out_dim)   bf16
    head_bo_ref,  # (1, out_dim)
    o_ref,        # (1, 1, out_dim)  f32   (written at last layer only)
    x_vmem,       # (N, D) f32 scratch: activations carried across layers
    *,
    heads: int,
    dim_head: int,
):
    layer = pl.program_id(1)
    n_layers = pl.num_programs(1)
    hd = heads * dim_head
    scale = 1.0 / (dim_head ** 0.5)

    # Load the (det-token + patch tokens) sequence once per batch element.
    @pl.when(layer == 0)
    def _():
        x_vmem[...] = x_ref[0].astype(jnp.float32)

    x = x_vmem[...]                                              # (N, D) f32

    # ---- Multi-head self-attention (pre-norm) ----
    xn = _layernorm(x, ln1_g_ref[0], ln1_b_ref[0])
    # Fused QKV projection: one lane-dense (N,D)@(D,3*H*Dh) bf16 MXU matmul.
    qkv = jnp.dot(xn.astype(jnp.bfloat16), wqkv_ref[0],
                  preferred_element_type=jnp.float32)            # (N, 3*H*Dh)
    q = (qkv[:, :hd] * scale).astype(jnp.bfloat16)               # scale folded into q
    k = qkv[:, hd:2 * hd].astype(jnp.bfloat16)
    v = qkv[:, 2 * hd:3 * hd].astype(jnp.bfloat16)

    head_outs = []
    for h in range(heads):                                       # small static unroll
        sl = slice(h * dim_head, (h + 1) * dim_head)
        s = jax.lax.dot_general(q[:, sl], k[:, sl],
                                (((1,), (1,)), ((), ())),
                                preferred_element_type=jnp.float32)   # (N, N)
        p = _softmax_last(s)
        head_outs.append(jnp.dot(p.astype(jnp.bfloat16), v[:, sl],
                                 preferred_element_type=jnp.float32))  # (N, Dh)
    # Concatenate heads -> single lane-dense output projection.
    o_cat = jnp.concatenate(head_outs, axis=-1).astype(jnp.bfloat16)   # (N, H*Dh)
    attn = jnp.dot(o_cat, wo_ref[0],
                   preferred_element_type=jnp.float32) + bo_ref[0]     # (N, D)
    x = x + attn

    # ---- Feed-forward (pre-norm) ----
    xn2 = _layernorm(x, ln2_g_ref[0], ln2_b_ref[0])
    h1 = jnp.dot(xn2.astype(jnp.bfloat16), w1_ref[0],
                 preferred_element_type=jnp.float32) + b1_ref[0]       # (N, mlp)
    # TODO(synk): PyTorch nn.GELU() defaults to the exact erf variant; tanh
    #             approximation used here for robust Mosaic lowering.
    h1 = jax.nn.gelu(h1, approximate=True)
    ff = jnp.dot(h1.astype(jnp.bfloat16), w2_ref[0],
                 preferred_element_type=jnp.float32) + b2_ref[0]       # (N, D)
    x = x + ff
    x_vmem[...] = x

    # ---- Classification head fused into the epilogue of the last layer ----
    @pl.when(layer == n_layers - 1)
    def _():
        cls = x[0:1, :]                                                # (1, D) detection token
        hh = jnp.dot(cls.astype(jnp.bfloat16), head_wh_ref[...],
                     preferred_element_type=jnp.float32) + head_bh_ref[...]
        hh = jnp.maximum(hh, 0.0)
        logits = jnp.dot(hh.astype(jnp.bfloat16), head_wo_ref[...],
                         preferred_element_type=jnp.float32) + head_bo_ref[...]
        o_ref[0] = _softmax_last(logits).astype(o_ref.dtype)          # softmax(dim=1)


def transformer_detector(x, params, *, heads, dim_head):
    """x: (B, H*W, C) -> (B, out_dim) class probabilities."""
    B, HW, D = x.shape
    N = HW + 1
    L, _, three_hd = params["wqkv"].shape
    mlp_dim = params["w1"].shape[-1]
    hid = params["head_wh"].shape[-1]
    out_dim = params["head_wo"].shape[-1]
    hd = heads * dim_head

    # Prepend the learned detection token (glue op, cheap).
    det = jnp.broadcast_to(params["detection_token"].reshape(1, 1, D), (B, 1, D))
    xt = jnp.concatenate([det, x], axis=1)                             # (B, N, D)

    kernel = functools.partial(transformer_stack_kernel,
                               heads=heads, dim_head=dim_head)
    # NOTE: at production sizes (D~768, mlp~3072) set
    #   compiler_params=pltpu.CompilerParams(..., vmem_limit_bytes=...)
    # and/or single-buffer the weight specs / tile mlp_dim so double-buffered
    # weights fit v7x's 64 MiB VMEM.  Toy sizes here need < 2 MiB.
    out = pl.pallas_call(
        kernel,
        out_shape=jax.ShapeDtypeStruct((B, 1, out_dim), jnp.float32),
        grid=(B, L),
        in_specs=[
            pl.BlockSpec((1, N, D), lambda b, l: (b, 0, 0)),          # x (per batch)
            pl.BlockSpec((1, 1, D), lambda b, l: (l, 0, 0)),          # ln1_g
            pl.BlockSpec((1, 1, D), lambda b, l: (l, 0, 0)),          # ln1_b
            pl.BlockSpec((1, D, three_hd), lambda b, l: (l, 0, 0)),   # wqkv
            pl.BlockSpec((1, hd, D), lambda b, l: (l, 0, 0)),         # wo
            pl.BlockSpec((1, 1, D), lambda b, l: (l, 0, 0)),          # bo
            pl.BlockSpec((1, 1, D), lambda b, l: (l, 0, 0)),          # ln2_g
            pl.BlockSpec((1, 1, D), lambda b, l: (l, 0, 0)),          # ln2_b
            pl.BlockSpec((1, D, mlp_dim), lambda b, l: (l, 0, 0)),    # w1
            pl.BlockSpec((1, 1, mlp_dim), lambda b, l: (l, 0, 0)),    # b1
            pl.BlockSpec((1, mlp_dim, D), lambda b, l: (l, 0, 0)),    # w2
            pl.BlockSpec((1, 1, D), lambda b, l: (l, 0, 0)),          # b2
            pl.BlockSpec((D, hid), lambda b, l: (0, 0)),              # head_wh
            pl.BlockSpec((1, hid), lambda b, l: (0, 0)),              # head_bh
            pl.BlockSpec((hid, out_dim), lambda b, l: (0, 0)),        # head_wo
            pl.BlockSpec((1, out_dim), lambda b, l: (0, 0)),          # head_bo
        ],
        out_specs=pl.BlockSpec((1, 1, out_dim), lambda b, l: (b, 0, 0)),
        scratch_shapes=[pltpu.VMEM((N, D), jnp.float32)],
        compiler_params=pltpu.CompilerParams(
            dimension_semantics=("parallel", "arbitrary")),
    )(xt, params["ln1_g"], params["ln1_b"], params["wqkv"], params["wo"],
      params["bo"], params["ln2_g"], params["ln2_b"], params["w1"], params["b1"],
      params["w2"], params["b2"], params["head_wh"], params["head_bh"],
      params["head_wo"], params["head_bo"])
    return out[:, 0, :]                                               # (B, out_dim)


# ----------------------------------------------------------------------------
# Deterministic synthetic parameters (shapes follow the PyTorch __init__);
# per-layer tensors are stacked along a leading L axis; matmul weights bf16.
# ----------------------------------------------------------------------------
def init_params(key, *, layers, dim, out_dim, heads, dim_head, mlp_dim,
                classification_hidden_dim):
    hd = heads * dim_head
    k_tok, k_rest = jax.random.split(key)
    params = {
        "detection_token": jax.random.truncated_normal(
            k_tok, -2.0, 2.0, (1, dim), jnp.float32) * 0.02,
    }

    def stacked(sub_idx, shape):
        ws = [jax.random.normal(jax.random.fold_in(jax.random.fold_in(k_rest, i), sub_idx),
                                shape, jnp.float32) * 0.02
              for i in range(layers)]
        return jnp.stack(ws, axis=0).astype(jnp.bfloat16)

    # TODO(synk): QKV projection has no bias here (vit-style to_qkv bias=False);
    #             verify against the reference Transformer block's Linear flags.
    params["ln1_g"] = jnp.ones((layers, 1, dim), jnp.float32)
    params["ln1_b"] = jnp.zeros((layers, 1, dim), jnp.float32)
    params["wqkv"] = stacked(0, (dim, 3 * hd))
    params["wo"] = stacked(1, (hd, dim))
    params["bo"] = jnp.zeros((layers, 1, dim), jnp.float32)
    params["ln2_g"] = jnp.ones((layers, 1, dim), jnp.float32)
    params["ln2_b"] = jnp.zeros((layers, 1, dim), jnp.float32)
    params["w1"] = stacked(2, (dim, mlp_dim))
    params["b1"] = jnp.zeros((layers, 1, mlp_dim), jnp.float32)
    params["w2"] = stacked(3, (mlp_dim, dim))
    params["b2"] = jnp.zeros((layers, 1, dim), jnp.float32)

    kh1, kh2 = jax.random.split(jax.random.fold_in(k_rest, 10_000))
    hid = classification_hidden_dim
    params["head_wh"] = (jax.random.normal(kh1, (dim, hid), jnp.float32) * 0.02
                         ).astype(jnp.bfloat16)
    params["head_bh"] = jnp.zeros((1, hid), jnp.float32)
    params["head_wo"] = (jax.random.normal(kh2, (hid, out_dim), jnp.float32) * 0.02
                         ).astype(jnp.bfloat16)
    params["head_bo"] = jnp.zeros((1, out_dim), jnp.float32)
    return params


if __name__ == "__main__":
    # Small, module-consistent, lane/sublane-aligned shapes:
    #   x: (B, H*W, C) = (2, 15, 128)  -> seq N = 16 (mult of 8), dim = 128.
    B, HW, dim = 2, 15, 128
    layers, heads, dim_head = 2, 4, 32      # heads * dim_head == dim
    mlp_dim = 256
    classification_hidden_dim = 32
    out_dim = 2                              # softmax over classes (dim=1)

    key = jax.random.PRNGKey(0)
    kx, kp = jax.random.split(key)
    x = jax.random.normal(kx, (B, HW, dim), jnp.float32)
    params = init_params(
        kp, layers=layers, dim=dim, out_dim=out_dim, heads=heads,
        dim_head=dim_head, mlp_dim=mlp_dim,
        classification_hidden_dim=classification_hidden_dim)

    out = transformer_detector(x, params, heads=heads, dim_head=dim_head)
    out = jax.block_until_ready(out)
    assert out.shape == (B, out_dim)
    print("KERNEL_OK")
</pallas_src>

<mosaic_0001>
module attributes {stable_mosaic.version = 11 : i64} {
  func.func @transformer_stack_kernel(%arg0: i32, %arg1: i32, %arg2: memref<1x16x128xf32, #tpu.memory_space<vmem>>, %arg3: memref<1x1x128xf32, #tpu.memory_space<vmem>>, %arg4: memref<1x1x128xf32, #tpu.memory_space<vmem>>, %arg5: memref<1x128x384xbf16, #tpu.memory_space<vmem>>, %arg6: memref<1x128x128xbf16, #tpu.memory_space<vmem>>, %arg7: memref<1x1x128xf32, #tpu.memory_space<vmem>>, %arg8: memref<1x1x128xf32, #tpu.memory_space<vmem>>, %arg9: memref<1x1x128xf32, #tpu.memory_space<vmem>>, %arg10: memref<1x128x256xbf16, #tpu.memory_space<vmem>>, %arg11: memref<1x1x256xf32, #tpu.memory_space<vmem>>, %arg12: memref<1x256x128xbf16, #tpu.memory_space<vmem>>, %arg13: memref<1x1x128xf32, #tpu.memory_space<vmem>>, %arg14: memref<128x32xbf16, #tpu.memory_space<vmem>>, %arg15: memref<1x32xf32, #tpu.memory_space<vmem>>, %arg16: memref<32x2xbf16, #tpu.memory_space<vmem>>, %arg17: memref<1x2xf32, #tpu.memory_space<vmem>>, %arg18: memref<1x1x2xf32, #tpu.memory_space<vmem>>, %arg19: memref<16x128xf32, #tpu.memory_space<vmem>>) attributes {dimension_semantics = [#tpu.dimension_semantics<parallel>, #tpu.dimension_semantics<arbitrary>], iteration_bounds = array<i64: 2, 2>, scalar_prefetch = 0 : i64, scratch_operands = 1 : i64, tpu.core_type = #tpu.core_type<tc>, window_params = [{transform_indices = @transform_0, window_bounds = array<i64: 1, 16, 128>}, {transform_indices = @transform_1, window_bounds = array<i64: 1, 1, 128>}, {transform_indices = @transform_2, window_bounds = array<i64: 1, 1, 128>}, {transform_indices = @transform_3, window_bounds = array<i64: 1, 128, 384>}, {transform_indices = @transform_4, window_bounds = array<i64: 1, 128, 128>}, {transform_indices = @transform_5, window_bounds = array<i64: 1, 1, 128>}, {transform_indices = @transform_6, window_bounds = array<i64: 1, 1, 128>}, {transform_indices = @transform_7, window_bounds = array<i64: 1, 1, 128>}, {transform_indices = @transform_8, window_bounds = array<i64: 1, 128, 256>}, {transform_indices = @transform_9, window_bounds = array<i64: 1, 1, 256>}, {transform_indices = @transform_10, window_bounds = array<i64: 1, 256, 128>}, {transform_indices = @transform_11, window_bounds = array<i64: 1, 1, 128>}, {pipeline_mode = #tpu.pipeline_mode<synchronous>, transform_indices = @transform_12, window_bounds = array<i64: 128, 32>}, {pipeline_mode = #tpu.pipeline_mode<synchronous>, transform_indices = @transform_13, window_bounds = array<i64: 1, 32>}, {pipeline_mode = #tpu.pipeline_mode<synchronous>, transform_indices = @transform_14, window_bounds = array<i64: 32, 2>}, {pipeline_mode = #tpu.pipeline_mode<synchronous>, transform_indices = @transform_15, window_bounds = array<i64: 1, 2>}, {transform_indices = @transform_16, window_bounds = array<i64: 1, 1, 2>}]} {
    %c0_i32 = arith.constant 0 : i32
    %0 = arith.cmpi eq, %arg1, %c0_i32 : i32
    %1 = arith.extui %0 : i1 to i32
    %c0_i32_0 = arith.constant 0 : i32
    %2 = arith.cmpi ne, %1, %c0_i32_0 : i32
    scf.if %2 {
      %c0_72 = arith.constant 0 : index
      %c0_73 = arith.constant 0 : index
      %c0_74 = arith.constant 0 : index
      %176 = vector.load %arg2[%c0_72, %c0_73, %c0_74] : memref<1x16x128xf32, #tpu.memory_space<vmem>>, vector<1x16x128xf32>
      %177 = vector.shape_cast %176 : vector<1x16x128xf32> to vector<16x128xf32>
      %c0_75 = arith.constant 0 : index
      %c0_76 = arith.constant 0 : index
      %178 = vector.load %arg19[%c0_75, %c0_76] : memref<16x128xf32, #tpu.memory_space<vmem>>, vector<16x128xf32>
      tpu.vector_store %arg19[%c0_75, %c0_76], %177 {strides = array<i32>} : memref<16x128xf32, #tpu.memory_space<vmem>>, vector<16x128xf32>,
    } else {
    }
    %c0 = arith.constant 0 : index
    %c0_1 = arith.constant 0 : index
    %3 = vector.load %arg19[%c0, %c0_1] : memref<16x128xf32, #tpu.memory_space<vmem>>, vector<16x128xf32>
    %c0_2 = arith.constant 0 : index
    %c0_3 = arith.constant 0 : index
    %c0_4 = arith.constant 0 : index
    %4 = vector.load %arg3[%c0_2, %c0_3, %c0_4] : memref<1x1x128xf32, #tpu.memory_space<vmem>>, vector<1x1x128xf32>
    %5 = vector.shape_cast %4 : vector<1x1x128xf32> to vector<1x128xf32>
    %c0_5 = arith.constant 0 : index
    %c0_6 = arith.constant 0 : index
    %c0_7 = arith.constant 0 : index
    %6 = vector.load %arg4[%c0_5, %c0_6, %c0_7] : memref<1x1x128xf32, #tpu.memory_space<vmem>>, vector<1x1x128xf32>
    %7 = vector.shape_cast %6 : vector<1x1x128xf32> to vector<1x128xf32>
    %cst = arith.constant dense<0.000000e+00> : vector<16xf32>
    %8 = vector.multi_reduction <add>, %3, %cst [1] : vector<16x128xf32> to vector<16xf32>
    %9 = vector.shape_cast %8 : vector<16xf32> to vector<16x1xf32>
    %cst_8 = arith.constant 1.280000e+02 : f32
    %10 = vector.broadcast %cst_8 : f32 to vector<16x1xf32>
    %11 = arith.divf %9, %10 : vector<16x1xf32>
    %12 = vector.broadcast %11 : vector<16x1xf32> to vector<16x128xf32>
    %13 = arith.subf %3, %12 : vector<16x128xf32>
    %14 = arith.mulf %13, %13 : vector<16x128xf32>
    %cst_9 = arith.constant dense<0.000000e+00> : vector<16xf32>
    %15 = vector.multi_reduction <add>, %14, %cst_9 [1] : vector<16x128xf32> to vector<16xf32>
    %16 = vector.shape_cast %15 : vector<16xf32> to vector<16x1xf32>
    %cst_10 = arith.constant 1.280000e+02 : f32
    %17 = vector.broadcast %cst_10 : f32 to vector<16x1xf32>
    %18 = arith.divf %16, %17 : vector<16x1xf32>
    %19 = vector.broadcast %11 : vector<16x1xf32> to vector<16x128xf32>
    %20 = arith.subf %3, %19 : vector<16x128xf32>
    %cst_11 = arith.constant 9.99999974E-6 : f32
    %21 = vector.broadcast %cst_11 : f32 to vector<16x1xf32>
    %22 = arith.addf %18, %21 : vector<16x1xf32>
    %23 = math.rsqrt %22 : vector<16x1xf32>
    %24 = vector.broadcast %23 : vector<16x1xf32> to vector<16x128xf32>
    %25 = arith.mulf %20, %24 : vector<16x128xf32>
    %26 = vector.broadcast %5 : vector<1x128xf32> to vector<16x128xf32>
    %27 = arith.mulf %25, %26 : vector<16x128xf32>
    %28 = vector.broadcast %7 : vector<1x128xf32> to vector<16x128xf32>
    %29 = arith.addf %27, %28 : vector<16x128xf32>
    %30 = arith.truncf %29 : vector<16x128xf32> to vector<16x128xbf16>
    %c0_12 = arith.constant 0 : index
    %c0_13 = arith.constant 0 : index
    %c0_14 = arith.constant 0 : index
    %31 = vector.load %arg5[%c0_12, %c0_13, %c0_14] : memref<1x128x384xbf16, #tpu.memory_space<vmem>>, vector<1x128x384xbf16>
    %32 = vector.shape_cast %31 : vector<1x128x384xbf16> to vector<128x384xbf16>
    %cst_15 = arith.constant dense<0.000000e+00> : vector<16x384xf32>
    %33 = tpu.matmul %30, %32, %cst_15 {dimension_numbers = #tpu.dot_dimension_numbers<[1], [0], [0], [1], [0, 0, 1, 1], [], []>} : vector<16x128xbf16>, vector<128x384xbf16>, vector<16x384xf32> -> vector<16x384xf32>
    %34 = vector.extract_strided_slice %33 {offsets = [0, 0], sizes = [16, 128], strides = [1, 1]} : vector<16x384xf32> to vector<16x128xf32>
    %cst_16 = arith.constant 0.176776692 : f32
    %35 = vector.broadcast %cst_16 : f32 to vector<16x128xf32>
    %36 = arith.mulf %34, %35 : vector<16x128xf32>
    %37 = arith.truncf %36 : vector<16x128xf32> to vector<16x128xbf16>
    %38 = vector.extract_strided_slice %33 {offsets = [0, 128], sizes = [16, 128], strides = [1, 1]} : vector<16x384xf32> to vector<16x128xf32>
    %39 = arith.truncf %38 : vector<16x128xf32> to vector<16x128xbf16>
    %40 = vector.extract_strided_slice %33 {offsets = [0, 256], sizes = [16, 128], strides = [1, 1]} : vector<16x384xf32> to vector<16x128xf32>
    %41 = arith.truncf %40 : vector<16x128xf32> to vector<16x128xbf16>
    %42 = vector.extract_strided_slice %37 {offsets = [0, 0], sizes = [16, 32], strides = [1, 1]} : vector<16x128xbf16> to vector<16x32xbf16>
    %43 = vector.extract_strided_slice %39 {offsets = [0, 0], sizes = [16, 32], strides = [1, 1]} : vector<16x128xbf16> to vector<16x32xbf16>
    %cst_17 = arith.constant dense<0.000000e+00> : vector<16x16xf32>
    %44 = tpu.matmul %42, %43, %cst_17 {dimension_numbers = #tpu.dot_dimension_numbers<[1], [1], [0], [0], [0, 0, 1, 0], [], []>} : vector<16x32xbf16>, vector<16x32xbf16>, vector<16x16xf32> -> vector<16x16xf32>
    %cst_18 = arith.constant dense<0xFF800000> : vector<16xf32>
    %45 = vector.multi_reduction <maximumf>, %44, %cst_18 [1] : vector<16x16xf32> to vector<16xf32>
    %46 = vector.shape_cast %45 : vector<16xf32> to vector<16x1xf32>
    %47 = vector.broadcast %46 : vector<16x1xf32> to vector<16x16xf32>
    %48 = arith.subf %44, %47 : vector<16x16xf32>
    %49 = math.exp %48 : vector<16x16xf32>
    %cst_19 = arith.constant dense<0.000000e+00> : vector<16xf32>
    %50 = vector.multi_reduction <add>, %49, %cst_19 [1] : vector<16x16xf32> to vector<16xf32>
    %51 = vector.shape_cast %50 : vector<16xf32> to vector<16x1xf32>
    %52 = tpu.reciprocal %51 {approx = true} : vector<16x1xf32> -> vector<16x1xf32>
    %53 = vector.broadcast %52 : vector<16x1xf32> to vector<16x16xf32>
    %54 = arith.mulf %49, %53 : vector<16x16xf32>
    %55 = arith.truncf %54 : vector<16x16xf32> to vector<16x16xbf16>
    %56 = vector.extract_strided_slice %41 {offsets = [0, 0], sizes = [16, 32], strides = [1, 1]} : vector<16x128xbf16> to vector<16x32xbf16>
    %cst_20 = arith.constant dense<0.000000e+00> : vector<16x32xf32>
    %57 = tpu.matmul %55, %56, %cst_20 {dimension_numbers = #tpu.dot_dimension_numbers<[1], [0], [0], [1], [0, 0, 1, 1], [], []>} : vector<16x16xbf16>, vector<16x32xbf16>, vector<16x32xf32> -> vector<16x32xf32>
    %58 = vector.extract_strided_slice %37 {offsets = [0, 32], sizes = [16, 32], strides = [1, 1]} : vector<16x128xbf16> to vector<16x32xbf16>
    %59 = vector.extract_strided_slice %39 {offsets = [0, 32], sizes = [16, 32], strides = [1, 1]} : vector<16x128xbf16> to vector<16x32xbf16>
    %cst_21 = arith.constant dense<0.000000e+00> : vector<16x16xf32>
    %60 = tpu.matmul %58, %59, %cst_21 {dimension_numbers = #tpu.dot_dimension_numbers<[1], [1], [0], [0], [0, 0, 1, 0], [], []>} : vector<16x32xbf16>, vector<16x32xbf16>, vector<16x16xf32> -> vector<16x16xf32>
    %cst_22 = arith.constant dense<0xFF800000> : vector<16xf32>
    %61 = vector.multi_reduction <maximumf>, %60, %cst_22 [1] : vector<16x16xf32> to vector<16xf32>
    %62 = vector.shape_cast %61 : vector<16xf32> to vector<16x1xf32>
    %63 = vector.broadcast %62 : vector<16x1xf32> to vector<16x16xf32>
    %64 = arith.subf %60, %63 : vector<16x16xf32>
    %65 = math.exp %64 : vector<16x16xf32>
    %cst_23 = arith.constant dense<0.000000e+00> : vector<16xf32>
    %66 = vector.multi_reduction <add>, %65, %cst_23 [1] : vector<16x16xf32> to vector<16xf32>
    %67 = vector.shape_cast %66 : vector<16xf32> to vector<16x1xf32>
    %68 = tpu.reciprocal %67 {approx = true} : vector<16x1xf32> -> vector<16x1xf32>
    %69 = vector.broadcast %68 : vector<16x1xf32> to vector<16x16xf32>
    %70 = arith.mulf %65, %69 : vector<16x16xf32>
    %71 = arith.truncf %70 : vector<16x16xf32> to vector<16x16xbf16>
    %72 = vector.extract_strided_slice %41 {offsets = [0, 32], sizes = [16, 32], strides = [1, 1]} : vector<16x128xbf16> to vector<16x32xbf16>
    %cst_24 = arith.constant dense<0.000000e+00> : vector<16x32xf32>
    %73 = tpu.matmul %71, %72, %cst_24 {dimension_numbers = #tpu.dot_dimension_numbers<[1], [0], [0], [1], [0, 0, 1, 1], [], []>} : vector<16x16xbf16>, vector<16x32xbf16>, vector<16x32xf32> -> vector<16x32xf32>
    %74 = vector.extract_strided_slice %37 {offsets = [0, 64], sizes = [16, 32], strides = [1, 1]} : vector<16x128xbf16> to vector<16x32xbf16>
    %75 = vector.extract_strided_slice %39 {offsets = [0, 64], sizes = [16, 32], strides = [1, 1]} : vector<16x128xbf16> to vector<16x32xbf16>
    %cst_25 = arith.constant dense<0.000000e+00> : vector<16x16xf32>
    %76 = tpu.matmul %74, %75, %cst_25 {dimension_numbers = #tpu.dot_dimension_numbers<[1], [1], [0], [0], [0, 0, 1, 0], [], []>} : vector<16x32xbf16>, vector<16x32xbf16>, vector<16x16xf32> -> vector<16x16xf32>
    %cst_26 = arith.constant dense<0xFF800000> : vector<16xf32>
    %77 = vector.multi_reduction <maximumf>, %76, %cst_26 [1] : vector<16x16xf32> to vector<16xf32>
    %78 = vector.shape_cast %77 : vector<16xf32> to vector<16x1xf32>
    %79 = vector.broadcast %78 : vector<16x1xf32> to vector<16x16xf32>
    %80 = arith.subf %76, %79 : vector<16x16xf32>
    %81 = math.exp %80 : vector<16x16xf32>
    %cst_27 = arith.constant dense<0.000000e+00> : vector<16xf32>
    %82 = vector.multi_reduction <add>, %81, %cst_27 [1] : vector<16x16xf32> to vector<16xf32>
    %83 = vector.shape_cast %82 : vector<16xf32> to vector<16x1xf32>
    %84 = tpu.reciprocal %83 {approx = true} : vector<16x1xf32> -> vector<16x1xf32>
    %85 = vector.broadcast %84 : vector<16x1xf32> to vector<16x16xf32>
    %86 = arith.mulf %81, %85 : vector<16x16xf32>
    %87 = arith.truncf %86 : vector<16x16xf32> to vector<16x16xbf16>
    %88 = vector.extract_strided_slice %41 {offsets = [0, 64], sizes = [16, 32], strides = [1, 1]} : vector<16x128xbf16> to vector<16x32xbf16>
    %cst_28 = arith.constant dense<0.000000e+00> : vector<16x32xf32>
    %89 = tpu.matmul %87, %88, %cst_28 {dimension_numbers = #tpu.dot_dimension_numbers<[1], [0], [0], [1], [0, 0, 1, 1], [], []>} : vector<16x16xbf16>, vector<16x32xbf16>, vector<16x32xf32> -> vector<16x32xf32>
    %90 = vector.extract_strided_slice %37 {offsets = [0, 96], sizes = [16, 32], strides = [1, 1]} : vector<16x128xbf16> to vector<16x32xbf16>
    %91 = vector.extract_strided_slice %39 {offsets = [0, 96], sizes = [16, 32], strides = [1, 1]} : vector<16x128xbf16> to vector<16x32xbf16>
    %cst_29 = arith.constant dense<0.000000e+00> : vector<16x16xf32>
    %92 = tpu.matmul %90, %91, %cst_29 {dimension_numbers = #tpu.dot_dimension_numbers<[1], [1], [0], [0], [0, 0, 1, 0], [], []>} : vector<16x32xbf16>, vector<16x32xbf16>, vector<16x16xf32> -> vector<16x16xf32>
    %cst_30 = arith.constant dense<0xFF800000> : vector<16xf32>
    %93 = vector.multi_reduction <maximumf>, %92, %cst_30 [1] : vector<16x16xf32> to vector<16xf32>
    %94 = vector.shape_cast %93 : vector<16xf32> to vector<16x1xf32>
    %95 = vector.broadcast %94 : vector<16x1xf32> to vector<16x16xf32>
    %96 = arith.subf %92, %95 : vector<16x16xf32>
    %97 = math.exp %96 : vector<16x16xf32>
    %cst_31 = arith.constant dense<0.000000e+00> : vector<16xf32>
    %98 = vector.multi_reduction <add>, %97, %cst_31 [1] : vector<16x16xf32> to vector<16xf32>
    %99 = vector.shape_cast %98 : vector<16xf32> to vector<16x1xf32>
    %100 = tpu.reciprocal %99 {approx = true} : vector<16x1xf32> -> vector<16x1xf32>
    %101 = vector.broadcast %100 : vector<16x1xf32> to vector<16x16xf32>
    %102 = arith.mulf %97, %101 : vector<16x16xf32>
    %103 = arith.truncf %102 : vector<16x16xf32> to vector<16x16xbf16>
    %104 = vector.extract_strided_slice %41 {offsets = [0, 96], sizes = [16, 32], strides = [1, 1]} : vector<16x128xbf16> to vector<16x32xbf16>
    %cst_32 = arith.constant dense<0.000000e+00> : vector<16x32xf32>
    %105 = tpu.matmul %103, %104, %cst_32 {dimension_numbers = #tpu.dot_dimension_numbers<[1], [0], [0], [1], [0, 0, 1, 1], [], []>} : vector<16x16xbf16>, vector<16x32xbf16>, vector<16x32xf32> -> vector<16x32xf32>
    %106 = tpu.concatenate %57, %73, %89, %105 in 1 : vector<16x32xf32>, vector<16x32xf32>, vector<16x32xf32>, vector<16x32xf32> -> vector<16x128xf32>
    %107 = arith.truncf %106 : vector<16x128xf32> to vector<16x128xbf16>
    %c0_33 = arith.constant 0 : index
    %c0_34 = arith.constant 0 : index
    %c0_35 = arith.constant 0 : index
    %108 = vector.load %arg6[%c0_33, %c0_34, %c0_35] : memref<1x128x128xbf16, #tpu.memory_space<vmem>>, vector<1x128x128xbf16>
    %109 = vector.shape_cast %108 : vector<1x128x128xbf16> to vector<128x128xbf16>
    %cst_36 = arith.constant dense<0.000000e+00> : vector<16x128xf32>
    %110 = tpu.matmul %107, %109, %cst_36 {dimension_numbers = #tpu.dot_dimension_numbers<[1], [0], [0], [1], [0, 0, 1, 1], [], []>} : vector<16x128xbf16>, vector<128x128xbf16>, vector<16x128xf32> -> vector<16x128xf32>
    %c0_37 = arith.constant 0 : index
    %c0_38 = arith.constant 0 : index
    %c0_39 = arith.constant 0 : index
    %111 = vector.load %arg7[%c0_37, %c0_38, %c0_39] : memref<1x1x128xf32, #tpu.memory_space<vmem>>, vector<1x1x128xf32>
    %112 = vector.shape_cast %111 : vector<1x1x128xf32> to vector<1x128xf32>
    %113 = vector.broadcast %112 : vector<1x128xf32> to vector<16x128xf32>
    %114 = arith.addf %110, %113 : vector<16x128xf32>
    %115 = arith.addf %3, %114 : vector<16x128xf32>
    %c0_40 = arith.constant 0 : index
    %c0_41 = arith.constant 0 : index
    %c0_42 = arith.constant 0 : index
    %116 = vector.load %arg8[%c0_40, %c0_41, %c0_42] : memref<1x1x128xf32, #tpu.memory_space<vmem>>, vector<1x1x128xf32>
    %117 = vector.shape_cast %116 : vector<1x1x128xf32> to vector<1x128xf32>
    %c0_43 = arith.constant 0 : index
    %c0_44 = arith.constant 0 : index
    %c0_45 = arith.constant 0 : index
    %118 = vector.load %arg9[%c0_43, %c0_44, %c0_45] : memref<1x1x128xf32, #tpu.memory_space<vmem>>, vector<1x1x128xf32>
    %119 = vector.shape_cast %118 : vector<1x1x128xf32> to vector<1x128xf32>
    %cst_46 = arith.constant dense<0.000000e+00> : vector<16xf32>
    %120 = vector.multi_reduction <add>, %115, %cst_46 [1] : vector<16x128xf32> to vector<16xf32>
    %121 = vector.shape_cast %120 : vector<16xf32> to vector<16x1xf32>
    %cst_47 = arith.constant 1.280000e+02 : f32
    %122 = vector.broadcast %cst_47 : f32 to vector<16x1xf32>
    %123 = arith.divf %121, %122 : vector<16x1xf32>
    %124 = vector.broadcast %123 : vector<16x1xf32> to vector<16x128xf32>
    %125 = arith.subf %115, %124 : vector<16x128xf32>
    %126 = arith.mulf %125, %125 : vector<16x128xf32>
    %cst_48 = arith.constant dense<0.000000e+00> : vector<16xf32>
    %127 = vector.multi_reduction <add>, %126, %cst_48 [1] : vector<16x128xf32> to vector<16xf32>
    %128 = vector.shape_cast %127 : vector<16xf32> to vector<16x1xf32>
    %cst_49 = arith.constant 1.280000e+02 : f32
    %129 = vector.broadcast %cst_49 : f32 to vector<16x1xf32>
    %130 = arith.divf %128, %129 : vector<16x1xf32>
    %131 = vector.broadcast %123 : vector<16x1xf32> to vector<16x128xf32>
    %132 = arith.subf %115, %131 : vector<16x128xf32>
    %cst_50 = arith.constant 9.99999974E-6 : f32
    %133 = vector.broadcast %cst_50 : f32 to vector<16x1xf32>
    %134 = arith.addf %130, %133 : vector<16x1xf32>
    %135 = math.rsqrt %134 : vector<16x1xf32>
    %136 = vector.broadcast %135 : vector<16x1xf32> to vector<16x128xf32>
    %137 = arith.mulf %132, %136 : vector<16x128xf32>
    %138 = vector.broadcast %117 : vector<1x128xf32> to vector<16x128xf32>
    %139 = arith.mulf %137, %138 : vector<16x128xf32>
    %140 = vector.broadcast %119 : vector<1x128xf32> to vector<16x128xf32>
    %141 = arith.addf %139, %140 : vector<16x128xf32>
    %142 = arith.truncf %141 : vector<16x128xf32> to vector<16x128xbf16>
    %c0_51 = arith.constant 0 : index
    %c0_52 = arith.constant 0 : index
    %c0_53 = arith.constant 0 : index
    %143 = vector.load %arg10[%c0_51, %c0_52, %c0_53] : memref<1x128x256xbf16, #tpu.memory_space<vmem>>, vector<1x128x256xbf16>
    %144 = vector.shape_cast %143 : vector<1x128x256xbf16> to vector<128x256xbf16>
    %cst_54 = arith.constant dense<0.000000e+00> : vector<16x256xf32>
    %145 = tpu.matmul %142, %144, %cst_54 {dimension_numbers = #tpu.dot_dimension_numbers<[1], [0], [0], [1], [0, 0, 1, 1], [], []>} : vector<16x128xbf16>, vector<128x256xbf16>, vector<16x256xf32> -> vector<16x256xf32>
    %c0_55 = arith.constant 0 : index
    %c0_56 = arith.constant 0 : index
    %c0_57 = arith.constant 0 : index
    %146 = vector.load %arg11[%c0_55, %c0_56, %c0_57] : memref<1x1x256xf32, #tpu.memory_space<vmem>>, vector<1x1x256xf32>
    %147 = vector.shape_cast %146 : vector<1x1x256xf32> to vector<1x256xf32>
    %148 = vector.broadcast %147 : vector<1x256xf32> to vector<16x256xf32>
    %149 = arith.addf %145, %148 : vector<16x256xf32>
    %150 = arith.mulf %149, %149 : vector<16x256xf32>
    %151 = arith.mulf %149, %150 : vector<16x256xf32>
    %cst_58 = arith.constant 4.471500e-02 : f32
    %152 = vector.broadcast %cst_58 : f32 to vector<16x256xf32>
    %153 = arith.mulf %152, %151 : vector<16x256xf32>
    %154 = arith.addf %149, %153 : vector<16x256xf32>
    %cst_59 = arith.constant 0.797884583 : f32
    %155 = vector.broadcast %cst_59 : f32 to vector<16x256xf32>
    %156 = arith.mulf %155, %154 : vector<16x256xf32>
    %157 = math.tanh %156 : vector<16x256xf32>
    %cst_60 = arith.constant 1.000000e+00 : f32
    %158 = vector.broadcast %cst_60 : f32 to vector<16x256xf32>
    %159 = arith.addf %158, %157 : vector<16x256xf32>
    %cst_61 = arith.constant 5.000000e-01 : f32
    %160 = vector.broadcast %cst_61 : f32 to vector<16x256xf32>
    %161 = arith.mulf %160, %159 : vector<16x256xf32>
    %162 = arith.mulf %149, %161 : vector<16x256xf32>
    %163 = arith.truncf %162 : vector<16x256xf32> to vector<16x256xbf16>
    %c0_62 = arith.constant 0 : index
    %c0_63 = arith.constant 0 : index
    %c0_64 = arith.constant 0 : index
    %164 = vector.load %arg12[%c0_62, %c0_63, %c0_64] : memref<1x256x128xbf16, #tpu.memory_space<vmem>>, vector<1x256x128xbf16>
    %165 = vector.shape_cast %164 : vector<1x256x128xbf16> to vector<256x128xbf16>
    %cst_65 = arith.constant dense<0.000000e+00> : vector<16x128xf32>
    %166 = tpu.matmul %163, %165, %cst_65 {dimension_numbers = #tpu.dot_dimension_numbers<[1], [0], [0], [1], [0, 0, 1, 1], [], []>} : vector<16x256xbf16>, vector<256x128xbf16>, vector<16x128xf32> -> vector<16x128xf32>
    %c0_66 = arith.constant 0 : index
    %c0_67 = arith.constant 0 : index
    %c0_68 = arith.constant 0 : index
    %167 = vector.load %arg13[%c0_66, %c0_67, %c0_68] : memref<1x1x128xf32, #tpu.memory_space<vmem>>, vector<1x1x128xf32>
    %168 = vector.shape_cast %167 : vector<1x1x128xf32> to vector<1x128xf32>
    %169 = vector.broadcast %168 : vector<1x128xf32> to vector<16x128xf32>
    %170 = arith.addf %166, %169 : vector<16x128xf32>
    %171 = arith.addf %115, %170 : vector<16x128xf32>
    %c0_69 = arith.constant 0 : index
    %c0_70 = arith.constant 0 : index
    %172 = vector.load %arg19[%c0_69, %c0_70] : memref<16x128xf32, #tpu.memory_space<vmem>>, vector<16x128xf32>
    tpu.vector_store %arg19[%c0_69, %c0_70], %171 {strides = array<i32>} : memref<16x128xf32, #tpu.memory_space<vmem>>, vector<16x128xf32>,
    %c1_i32 = arith.constant 1 : i32
    %173 = arith.cmpi eq, %arg1, %c1_i32 : i32
    %174 = arith.extui %173 : i1 to i32
    %c0_i32_71 = arith.constant 0 : i32
    %175 = arith.cmpi ne, %174, %c0_i32_71 : i32
    scf.if %175 {
      %176 = vector.extract_strided_slice %171 {offsets = [0, 0], sizes = [1, 128], strides = [1, 1]} : vector<16x128xf32> to vector<1x128xf32>
      %177 = arith.truncf %176 : vector<1x128xf32> to vector<1x128xbf16>
      %c0_72 = arith.constant 0 : index
      %c0_73 = arith.constant 0 : index
      %178 = vector.load %arg14[%c0_72, %c0_73] : memref<128x32xbf16, #tpu.memory_space<vmem>>, vector<128x32xbf16>
      %cst_74 = arith.constant dense<0.000000e+00> : vector<1x32xf32>
      %179 = tpu.matmul %177, %178, %cst_74 {dimension_numbers = #tpu.dot_dimension_numbers<[1], [0], [0], [1], [0, 0, 1, 1], [], []>} : vector<1x128xbf16>, vector<128x32xbf16>, vector<1x32xf32> -> vector<1x32xf32>
      %c0_75 = arith.constant 0 : index
      %c0_76 = arith.constant 0 : index
      %180 = vector.load %arg15[%c0_75, %c0_76] : memref<1x32xf32, #tpu.memory_space<vmem>>, vector<1x32xf32>
      %181 = arith.addf %179, %180 : vector<1x32xf32>
      %cst_77 = arith.constant 0.000000e+00 : f32
      %182 = vector.broadcast %cst_77 : f32 to vector<1x32xf32>
      %183 = arith.maximumf %181, %182 : vector<1x32xf32>
      %184 = arith.truncf %183 : vector<1x32xf32> to vector<1x32xbf16>
      %c0_78 = arith.constant 0 : index
      %c0_79 = arith.constant 0 : index
      %185 = vector.load %arg16[%c0_78, %c0_79] : memref<32x2xbf16, #tpu.memory_space<vmem>>, vector<32x2xbf16>
      %cst_80 = arith.constant dense<0.000000e+00> : vector<1x2xf32>
      %186 = tpu.matmul %184, %185, %cst_80 {dimension_numbers = #tpu.dot_dimension_numbers<[1], [0], [0], [1], [0, 0, 1, 1], [], []>} : vector<1x32xbf16>, vector<32x2xbf16>, vector<1x2xf32> -> vector<1x2xf32>
      %c0_81 = arith.constant 0 : index
      %c0_82 = arith.constant 0 : index
      %187 = vector.load %arg17[%c0_81, %c0_82] : memref<1x2xf32, #tpu.memory_space<vmem>>, vector<1x2xf32>
      %188 = arith.addf %186, %187 : vector<1x2xf32>
      %cst_83 = arith.constant dense<0xFF800000> : vector<1xf32>
      %189 = vector.multi_reduction <maximumf>, %188, %cst_83 [1] : vector<1x2xf32> to vector<1xf32>
      %190 = vector.shape_cast %189 : vector<1xf32> to vector<1x1xf32>
      %191 = vector.broadcast %190 : vector<1x1xf32> to vector<1x2xf32>
      %192 = arith.subf %188, %191 : vector<1x2xf32>
      %193 = math.exp %192 : vector<1x2xf32>
      %cst_84 = arith.constant dense<0.000000e+00> : vector<1xf32>
      %194 = vector.multi_reduction <add>, %193, %cst_84 [1] : vector<1x2xf32> to vector<1xf32>
      %195 = vector.shape_cast %194 : vector<1xf32> to vector<1x1xf32>
      %196 = tpu.reciprocal %195 {approx = true} : vector<1x1xf32> -> vector<1x1xf32>
      %197 = vector.broadcast %196 : vector<1x1xf32> to vector<1x2xf32>
      %198 = arith.mulf %193, %197 : vector<1x2xf32>
      %c0_85 = arith.constant 0 : index
      %c0_86 = arith.constant 0 : index
      %c0_87 = arith.constant 0 : index
      %199 = vector.load %arg18[%c0_85, %c0_86, %c0_87] : memref<1x1x2xf32, #tpu.memory_space<vmem>>, vector<1x1x2xf32>
      %200 = vector.shape_cast %199 : vector<1x1x2xf32> to vector<1x2xf32>
      %201 = vector.shape_cast %198 : vector<1x2xf32> to vector<1x1x2xf32>
      tpu.vector_store %arg18[%c0_85, %c0_86, %c0_87], %201 {strides = array<i32>} : memref<1x1x2xf32, #tpu.memory_space<vmem>>, vector<1x1x2xf32>,
    } else {
    }
    return
  }
  func.func @transform_0(%arg0: i32, %arg1: i32) -> (i32, i32, i32) {
    %c0_i32 = arith.constant 0 : i32
    %c0_i32_0 = arith.constant 0 : i32
    %c0_i32_1 = arith.constant 0 : i32
    return %arg0, %c0_i32, %c0_i32_0 : i32, i32, i32
  }
  func.func @transform_1(%arg0: i32, %arg1: i32) -> (i32, i32, i32) {
    %c0_i32 = arith.constant 0 : i32
    %c0_i32_0 = arith.constant 0 : i32
    %c0_i32_1 = arith.constant 0 : i32
    return %arg1, %c0_i32, %c0_i32_0 : i32, i32, i32
  }
  func.func @transform_2(%arg0: i32, %arg1: i32) -> (i32, i32, i32) {
    %c0_i32 = arith.constant 0 : i32
    %c0_i32_0 = arith.constant 0 : i32
    %c0_i32_1 = arith.constant 0 : i32
    return %arg1, %c0_i32, %c0_i32_0 : i32, i32, i32
  }
  func.func @transform_3(%arg0: i32, %arg1: i32) -> (i32, i32, i32) {
    %c0_i32 = arith.constant 0 : i32
    %c0_i32_0 = arith.constant 0 : i32
    %c0_i32_1 = arith.constant 0 : i32
    return %arg1, %c0_i32, %c0_i32_0 : i32, i32, i32
  }
  func.func @transform_4(%arg0: i32, %arg1: i32) -> (i32, i32, i32) {
    %c0_i32 = arith.constant 0 : i32
    %c0_i32_0 = arith.constant 0 : i32
    %c0_i32_1 = arith.constant 0 : i32
    return %arg1, %c0_i32, %c0_i32_0 : i32, i32, i32
  }
  func.func @transform_5(%arg0: i32, %arg1: i32) -> (i32, i32, i32) {
    %c0_i32 = arith.constant 0 : i32
    %c0_i32_0 = arith.constant 0 : i32
    %c0_i32_1 = arith.constant 0 : i32
    return %arg1, %c0_i32, %c0_i32_0 : i32, i32, i32
  }
  func.func @transform_6(%arg0: i32, %arg1: i32) -> (i32, i32, i32) {
    %c0_i32 = arith.constant 0 : i32
    %c0_i32_0 = arith.constant 0 : i32
    %c0_i32_1 = arith.constant 0 : i32
    return %arg1, %c0_i32, %c0_i32_0 : i32, i32, i32
  }
  func.func @transform_7(%arg0: i32, %arg1: i32) -> (i32, i32, i32) {
    %c0_i32 = arith.constant 0 : i32
    %c0_i32_0 = arith.constant 0 : i32
    %c0_i32_1 = arith.constant 0 : i32
    return %arg1, %c0_i32, %c0_i32_0 : i32, i32, i32
  }
  func.func @transform_8(%arg0: i32, %arg1: i32) -> (i32, i32, i32) {
    %c0_i32 = arith.constant 0 : i32
    %c0_i32_0 = arith.constant 0 : i32
    %c0_i32_1 = arith.constant 0 : i32
    return %arg1, %c0_i32, %c0_i32_0 : i32, i32, i32
  }
  func.func @transform_9(%arg0: i32, %arg1: i32) -> (i32, i32, i32) {
    %c0_i32 = arith.constant 0 : i32
    %c0_i32_0 = arith.constant 0 : i32
    %c0_i32_1 = arith.constant 0 : i32
    return %arg1, %c0_i32, %c0_i32_0 : i32, i32, i32
  }
  func.func @transform_10(%arg0: i32, %arg1: i32) -> (i32, i32, i32) {
    %c0_i32 = arith.constant 0 : i32
    %c0_i32_0 = arith.constant 0 : i32
    %c0_i32_1 = arith.constant 0 : i32
    return %arg1, %c0_i32, %c0_i32_0 : i32, i32, i32
  }
  func.func @transform_11(%arg0: i32, %arg1: i32) -> (i32, i32, i32) {
    %c0_i32 = arith.constant 0 : i32
    %c0_i32_0 = arith.constant 0 : i32
    %c0_i32_1 = arith.constant 0 : i32
    return %arg1, %c0_i32, %c0_i32_0 : i32, i32, i32
  }
  func.func @transform_12(%arg0: i32, %arg1: i32) -> (i32, i32) {
    %c0_i32 = arith.constant 0 : i32
    %c0_i32_0 = arith.constant 0 : i32
    %c0_i32_1 = arith.constant 0 : i32
    return %c0_i32, %c0_i32_0 : i32, i32
  }
  func.func @transform_13(%arg0: i32, %arg1: i32) -> (i32, i32) {
    %c0_i32 = arith.constant 0 : i32
    %c0_i32_0 = arith.constant 0 : i32
    %c0_i32_1 = arith.constant 0 : i32
    return %c0_i32, %c0_i32_0 : i32, i32
  }
  func.func @transform_14(%arg0: i32, %arg1: i32) -> (i32, i32) {
    %c0_i32 = arith.constant 0 : i32
    %c0_i32_0 = arith.constant 0 : i32
    %c0_i32_1 = arith.constant 0 : i32
    return %c0_i32, %c0_i32_0 : i32, i32
  }
  func.func @transform_15(%arg0: i32, %arg1: i32) -> (i32, i32) {
    %c0_i32 = arith.constant 0 : i32
    %c0_i32_0 = arith.constant 0 : i32
    %c0_i32_1 = arith.constant 0 : i32
    return %c0_i32, %c0_i32_0 : i32, i32
  }
  func.func @transform_16(%arg0: i32, %arg1: i32) -> (i32, i32, i32) {
    %c0_i32 = arith.constant 0 : i32
    %c0_i32_0 = arith.constant 0 : i32
    %c0_i32_1 = arith.constant 0 : i32
    return %arg0, %c0_i32, %c0_i32_0 : i32, i32, i32
  }
}

</mosaic_0001>

<bundles_post_ra>
// kernel: tpu_custom_call.1
= control target key start
LH: loop header
LB: loop body
LE: loop exit
PB: predicated region body
PF: predicated region fallthrough
CT: control target
= control target key end

     0   :  { %s4167_s0 = inlined_call_operand.vmem [shape: f32[2,16,128], index: 0, kind: input, shape index: {}]   ;;  %s4168_s1 = inlined_call_operand.vmem [shape: f32[2,1,128], index: 1, kind: input, shape index: {}]   ;;  %s4169_s2 = inlined_call_operand.vmem [shape: f32[2,1,128], index: 2, kind: input, shape index: {}]   ;;  %s4170_s3 = inlined_call_operand.hbm [shape: bf16[2,128,384], index: 3, kind: input, shape index: {}]   ;;  %s4171_s4 = inlined_call_operand.hbm [shape: bf16[2,128,128], index: 4, kind: input, shape index: {}]   ;;  %s4172_s5 = inlined_call_operand.vmem [shape: f32[2,1,128], index: 5, kind: input, shape index: {}]   ;;  %s4173_s6 = inlined_call_operand.vmem [shape: f32[2,1,128], index: 6, kind: input, shape index: {}]   ;;  %s4174_s7 = inlined_call_operand.vmem [shape: f32[2,1,128], index: 7, kind: input, shape index: {}]   ;;  %s4175_s8 = inlined_call_operand.hbm [shape: bf16[2,128,256], index: 8, kind: input, shape index: {}]   ;;  %s4176_s9 = inlined_call_operand.vmem [shape: f32[2,1,256], index: 9, kind: input, shape index: {}]   ;;  %s4177_s10 = inlined_call_operand.hbm [shape: bf16[2,256,128], index: 10, kind: input, shape index: {}]   ;;  %s4178_s11 = inlined_call_operand.vmem [shape: f32[2,1,128], index: 11, kind: input, shape index: {}]   ;;  %s4179_s12 = inlined_call_operand.vmem [shape: bf16[128,32], index: 12, kind: input, shape index: {}]   ;;  %s4180_s13 = inlined_call_operand.vmem [shape: f32[1,32], index: 13, kind: input, shape index: {}]   ;;  %s4181_s14 = inlined_call_operand.vmem [shape: bf16[32,2], index: 14, kind: input, shape index: {}]   ;;  %s4182_s15 = inlined_call_operand.vmem [shape: f32[1,2], index: 15, kind: input, shape index: {}]   ;;  %s4183_s16 = inlined_call_operand.hbm [shape: f32[2,1,2], index: 16, kind: output, shape index: {}]  }
   0x1   :  { %4205 = sst [smem:[#allocation30_spill]] %s4167_s0 }
   0x2   :  { %4206 = sst [smem:[#allocation31_spill]] %s4170_s3 }
   0x3   :  { %4207 = sst [smem:[#allocation32_spill]] %s4171_s4 }
   0x4   :  { %4208 = sst [smem:[#allocation33_spill]] %s4174_s7 }
   0x5   :  { %4209 = sst [smem:[#allocation34_spill]] %s4175_s8 }
   0x6   :  { %4210 = sst [smem:[#allocation35_spill]] %s4176_s9 }
   0x7   :  { %4211 = sst [smem:[#allocation36_spill]] %s4177_s10 }
   0x8   :  { %4212 = sst [smem:[#allocation37_spill]] %s4178_s11 }
   0x9   :  { %4213 = sst [smem:[#allocation38_spill]] %s4179_s12 }
   0xa   :  { %4214 = sst [smem:[#allocation39_spill]] %s4180_s13 }
   0xb   :  { %4215 = sst [smem:[#allocation40_spill]] %s4181_s14 }
   0xc   :  { %4216 = sst [smem:[#allocation41_spill]] %s4182_s15 }
   0xd   :  { %4217 = sst [smem:[#allocation42_spill]] %s4183_s16 }
   0xe   :  { %21 = vsyncpa [#allocation4], 0 }
   0xf   :  { %23 = vsyncpa [#allocation4 + $0x1], 0 }
  0x10   :  { %24 = vsyncpa [#allocation7], 0 }
  0x11   :  { %26 = vsyncpa [#allocation7 + $0x1], 0 }
  0x12   :  { %27 = vsyncpa [#allocation10], 0 }
  0x13   :  { %29 = vsyncpa [#allocation10 + $0x1], 0 }
  0x14   :  { %30 = vsyncpa [#allocation5], 0 }
  0x15   :  { %32 = vsyncpa [#allocation5 + $0x1], 0  ;;  %s3499_s21 = smov 0   ;;  %s3501_s22 = smov 0  }
  0x16   :  { %s3503_s23 = smov 0   ;;  %s3505_s24 = smov 0  }
  0x17   :  { %s3507_s25 = smov 0   ;;  %s3509_s26 = smov 0  }
  0x18   :  { %s3511_s27 = smov 0   ;;  %s3513_s28 = smov 0  }
  0x19   :  { %s3515_s29 = smov 0   ;;  %s3517_s30 = smov 0  }
  0x1a   :  { %s3519_s0 = smov 0  }
  0x1b LB: > { %4218 = sst [smem:[#allocation16_spill]] %s3353_s21  ;;  %s3553_s17 = sadd.s32 4294967295, %s3393_s0   ;;  %s3393_s0 = sphi %s3519_s0, %s38_s0   ;;  %s3389_s30 = sphi %s3517_s30, %s4287_s30   ;;  %s3385_s29 = sphi %s3515_s29, %s4286_s29   ;;  %s3381_s28 = sphi %s3513_s28, %s4285_s28   ;;  %s3377_s27 = sphi %s3511_s27, %s4284_s27   ;;  %s3373_s26 = sphi %s3509_s26, %s4276_s26   ;;  %s3369_s25 = sphi %s3507_s25, %s4283_s25   ;;  %s3365_s24 = sphi %s3505_s24, %s4274_s24   ;;  %s3361_s23 = sphi %s3503_s23, %s4273_s23   ;;  %s3357_s22 = sphi %s3501_s22, %s4282_s22   ;;  %s3353_s21 = sphi %s3499_s21, %s4281_s21  }
  0x1c   : > { %4219 = sst [smem:[#allocation17_spill]] %s3361_s23  ;;  %s2550_s18 = sadd.s32 4294967294, %s3393_s0  }
  0x1d   : > { %4220 = sst [smem:[#allocation18_spill]] %s3369_s25  ;;  %s47_s19 = sadd.s32 1, %s3385_s29 }
  0x1e   : > { %4221 = sst [smem:[#allocation19_spill]] %s3373_s26  ;;  %s50_s20 = sadd.s32 1, %s3389_s30 }
  0x1f   : > { %4222 = sst [smem:[#allocation20_spill]] %s3381_s28  ;;  %p48_p0 = scmp.ge.s32.totalorder %s47_s19, 2 }
  0x20   : > { %4223 = sst [smem:[#allocation21_spill]] %s3385_s29  ;;  %s135_s16 = sadd.s32 1, %s3373_s26 }
  0x21   : > { %4224 = sst [smem:[#allocation22_spill]] %s3389_s30  ;;  %p142_p1 = scmp.ne.s32.totalorder %s3373_s26, %s3369_s25 }
  0x22   : > { %4225 = sst [smem:[#allocation23_spill]] %s3393_s0  ;;  %p143_p2 = scmp.eq.s32.totalorder %s3393_s0, 0 }
  0x23   : > { %s4289_s19 = smov (%p48_p0, %s47_s19), 0  ;;  %s4291_s20 = smov (!%p48_p0, %s50_s20), %s3389_s30 }
  0x24   : > { %4226 = sst [smem:[#allocation24_spill]] %s4289_s19  ;;  %s132_s15 = ssub.s32 %s3385_s29, %s4289_s19 }
  0x25   : > { %p3567_p3 = por %p143_p2, %p142_p1  ;;  %p52_p4 = scmp.ge.s32.totalorder %s4291_s20, 2 }
  0x26   : > { %p133_p5 = scmp.eq.s32.totalorder %s132_s15, 0  ;;  %p148_p6 = scmp.ne.s32.totalorder %s3369_s25, %s3365_s24 }
  0x27   : > { %p149_p7 = scmp.eq.s32.totalorder %s3553_s17, 0  ;;  %s4293_s20 = smov (%p52_p4, %s4291_s20), 0 }
  0x28   : > { %4228 = sst [smem:[#allocation25_spill]] %s4293_s20  ;;  %s450_s12 = ssub.s32 %s3389_s30, %s4293_s20 }
  0x29   : > { %s3576_s14 = scalar_select %p133_p5, %s3373_s26, %s135_s16  }
  0x2a   : > { %p3578_p8 = por %p149_p7, %p148_p6  ;;  %p451_p9 = scmp.eq.s32.totalorder %s450_s12, 0 }
  0x2b   : > { %4229 = sst [smem:[#allocation26_spill]] %s3576_s14  ;;  %s453_s9 = sadd.s32 1, %s3361_s23 }
  0x2c   : > { %s4230_s19 = scalar_select %p3578_p8, 1, 0 }
  0x2d   : > { %p463_p10 = scmp.ne.s32.totalorder %s3361_s23, %s3357_s22  ;;  %p464_p11 = scmp.eq.s32.totalorder %s3553_s17, 3 }
  0x2e   : > { %s3589_s15 = scalar_select %p451_p9, %s3361_s23, %s453_s9  }
  0x2f   : > { %p3591_p12 = por %p464_p11, %p463_p10  ;;  %p469_p13 = scmp.ne.s32.totalorder %s3357_s22, %s3353_s21 }
  0x30   : > { %4231 = sst [smem:[#allocation27_spill]] %s3589_s15  ;;  %p470_p0 = scmp.eq.s32.totalorder %s2550_s18, 3 }
  0x31   : > { %s4232_s24 = scalar_select %p3591_p12, 1, 0 }
  0x32   : > { %p2882_p1 = scmp.lt.s32.totalorder %s3393_s0, 4  ;;  %s3599_s16 = sand.u32 1, %s3373_s26  }
  0x33   : > { %4233 = sst [smem:[#allocation28_spill]] %s4232_s24  ;;  %p3601_p2 = por %p470_p0, %p469_p13 }
  0x34   : > { %s543_s12 = sand.u32 1, %s3393_s0   ;;  %p3608_p4 = pnand %p2882_p1, %p3567_p3 }
  0x35   : > { %s4234_s14 = scalar_select %p3601_p2, 1, 0 }
  0x36   : > { %s2554_s9 = sshll.u32 %s3599_s16, 6  ;;  %s2664_s30 = sshll.u32 %s3385_s29, 10 }
  0x37   : > { %4235 = sst [smem:[#allocation29_spill]] %s4234_s14  ;;  %s547_s26 = scalar_lea.vmem [#allocation6], %s2554_s9 }
  0x38   : > { %s4237_s4 = sld [smem:[#allocation32_spill]]  ;;  %s554_s14 = sshll.u32 %s547_s26, 4  ;;  %s3619_s14 = int_to_ptr.vmem [resolvable:$true] %s554_s14 }
  0x39   : > { %s3622_s13 = scalar_lea.sflag [#allocation7], %s543_s12  ;;  %p3628_p6 = pneg %p3608_p4 }
  0x3e   : > { %s3617_s18 = scalar_lea.hbm %s4237_s4, %s2664_s30  ;;  %s3148_s26 = scalar_lea.hbm %s4237_s4, 2048 }
  0x3f   : > { %s3143_s21 = scalar_lea.hbm %s3617_s18, 1024  ;;  %p3149_p10 = scmp.lt.u32.totalorder %s3617_s18, %s4237_s4 }
  0x40   : > { %p3144_p5 = scmp.ne.s32.totalorder %s3617_s18, %s3143_s21  ;;  %p3150_p11 = scmp.lt.u32.totalorder %s3148_s26, %s3143_s21 }
  0x41   : > { %p3152_p0 = scmp.lt.u32.totalorder %s3143_s21, %s3617_s18 }
  0x42   : > { %p3146_p7 = pnand %p3628_p6, %p3144_p5  ;;  %p3151_p13 = por %p3150_p11, %p3149_p10 }
  0x44   : > { %p3147_p9 = pneg %p3146_p7  ;;  %p3153_p1 = por %p3152_p0, %p3151_p13 }
  0x46   : > { %p3154_p3 = pnand %p3153_p1, %p3147_p9 }
  0x48   : > { %3157 = shalt.err (!%p3154_p3)
}
  0x49   : > { %s3158_s12 = scalar_lea.vmem %s3619_s14, 1024  ;;  %s3395_s23 = smov [#allocation6]  }
  0x4a   : > { %p3159_p5 = scmp.ne.s32.totalorder %s3619_s14, %s3158_s12  ;;  %s3163_s30 = sshll.u32 %s3395_s23, 4  ;;  %s3164_s30 = int_to_ptr.vmem [resolvable:$false] %s3163_s30 }
  0x4b   : > { %s3165_s15 = scalar_lea.vmem %s3164_s30, 2048  ;;  %p3166_p12 = scmp.lt.s32.totalorder %s3619_s14, %s3164_s30 }
  0x4c   : > { %p3161_p7 = pnand %p3159_p5, %p3628_p6  ;;  %p3167_p8 = scmp.lt.s32.totalorder %s3165_s15, %s3158_s12 }
  0x4e   : > { %p3162_p2 = pneg %p3161_p7  ;;  %p3168_p10 = por %p3167_p8, %p3166_p12 }
  0x50   : > { %p3169_p11 = pnand %p3168_p10, %p3162_p2 }
  0x52   : > { %3172 = shalt.err (!%p3169_p11)
}
  0x53   : > { %s4198_s21 = smov 64   ;;  %s4199_s26 = smov 4  }
  0x54   : > { %2871 = dma.hbm_to_vmem [thread:$0]  (!%p3608_p4), %s3617_s18, 1024, %s3619_s14, %s3622_s13, %s4198_s21, %s4198_s21, %s4199_s26  }
  0x55   : > { %p635_p8 = scmp.lt.s32.totalorder %s3393_s0, 5  ;;  %p4239_p12 = scmp.ge.s32.totalorder %s3393_s0, 1 }
  0x56   : > { %s2852_s12 = smul.u32 192, %s3599_s16  ;;  %s4241_s3 = sld [smem:[#allocation31_spill]] }
  0x57   : > { %p3658_p2 = pnand %p4239_p12, %p635_p8  ;;  %s2853_s23 = smul.u32 3072, %s3385_s29 }
  0x58   : > { %s526_s11 = scalar_lea.vmem [#allocation3], %s2852_s12  ;;  %s2557_s14 = sshll.u32 %s3599_s16, 7 }
  0x59   : > { %s4240_s9 = scalar_select %p3658_p2, 1, 0 }
  0x5a   : > { %s533_s7 = sshll.u32 %s526_s11, 4  ;;  %s523_s18 = scalar_lea.sflag [#allocation4], %s3599_s16  ;;  %s3669_s7 = int_to_ptr.vmem [resolvable:$true] %s533_s7 }
  0x5c   : > { %s3667_s4 = scalar_lea.hbm %s4241_s3, %s2853_s23  ;;  %s3178_s23 = scalar_lea.hbm %s4241_s3, 6144 }
  0x5d   : > { %s3173_s21 = scalar_lea.hbm %s3667_s4, 3072  ;;  %p3179_p0 = scmp.lt.u32.totalorder %s3667_s4, %s4241_s3 }
  0x5e   : > { %p3174_p3 = scmp.ne.s32.totalorder %s3667_s4, %s3173_s21  ;;  %p3180_p1 = scmp.lt.u32.totalorder %s3178_s23, %s3173_s21 }
  0x5f   : > { %p3182_p7 = scmp.lt.u32.totalorder %s3173_s21, %s3667_s4 }
  0x60   : > { %p3176_p9 = pnand %p3174_p3, %p3628_p6  ;;  %p3181_p5 = por %p3180_p1, %p3179_p0 }
  0x62   : > { %p3177_p13 = pneg %p3176_p9  ;;  %p3183_p10 = por %p3182_p7, %p3181_p5 }
  0x64   : > { %p3184_p11 = pnand %p3183_p10, %p3177_p13 }
  0x66   : > { %3187 = shalt.err (!%p3184_p11)
}
  0x67   : > { %s3188_s11 = scalar_lea.vmem %s3669_s7, 3072  ;;  %s3398_s0 = smov [#allocation3]  }
  0x68   : > { %p3189_p8 = scmp.ne.s32.totalorder %s3669_s7, %s3188_s11  ;;  %s3193_s26 = sshll.u32 %s3398_s0, 4  ;;  %s3194_s26 = int_to_ptr.vmem [resolvable:$false] %s3193_s26 }
  0x69   : > { %s3195_s12 = scalar_lea.vmem %s3194_s26, 6144  ;;  %p3196_p9 = scmp.lt.s32.totalorder %s3669_s7, %s3194_s26 }
  0x6a   : > { %p3191_p12 = pnand %p3189_p8, %p3628_p6  ;;  %p3197_p2 = scmp.lt.s32.totalorder %s3195_s12, %s3188_s11 }
  0x6c   : > { %p3192_p3 = pneg %p3191_p12  ;;  %p3198_p0 = por %p3197_p2, %p3196_p9 }
  0x6e   : > { %p3199_p1 = pnand %p3198_p0, %p3192_p3 }
  0x70   : > { %3202 = shalt.err (!%p3199_p1)
}
  0x71   : > { %s3399_s21 = smov 192   ;;  %s3400_s23 = smov 12  }
  0x72   : > { %2868 = dma.hbm_to_vmem [thread:$0]  (!%p3608_p4), %s3667_s4, 3072, %s3669_s7, %s523_s18, %s3399_s21, %s3399_s21, %s3400_s23  }
  0x73   : > { %s2665_s30 = sshll.u32 %s3385_s29, 11  ;;  %s4242_s8 = sld [smem:[#allocation34_spill]] }
  0x74   : > { %s586_s26 = scalar_lea.vmem [#allocation8], %s2557_s14 }
  0x75   : > { %s593_s12 = sshll.u32 %s586_s26, 4  ;;  %s3706_s12 = int_to_ptr.vmem [resolvable:$true] %s593_s12 }
  0x79   : > { %s3702_s0 = scalar_lea.hbm %s4242_s8, %s2665_s30  ;;  %s3208_s18 = scalar_lea.hbm %s4242_s8, 4096 }
  0x7a   : > { %s3203_s3 = scalar_lea.hbm %s3702_s0, 2048  ;;  %p3209_p7 = scmp.lt.u32.totalorder %s3702_s0, %s4242_s8 }
  0x7b   : > { %p3204_p2 = scmp.ne.s32.totalorder %s3702_s0, %s3203_s3  ;;  %p3210_p10 = scmp.lt.u32.totalorder %s3208_s18, %s3203_s3 }
  0x7c   : > { %p3212_p8 = scmp.lt.u32.totalorder %s3203_s3, %s3702_s0 }
  0x7d   : > { %p3206_p13 = pnand %p3204_p2, %p3628_p6  ;;  %p3211_p11 = por %p3210_p10, %p3209_p7 }
  0x7f   : > { %p3207_p5 = pneg %p3206_p13  ;;  %p3213_p12 = por %p3212_p8, %p3211_p11 }
  0x81   : > { %p3214_p3 = pnand %p3213_p12, %p3207_p5 }
  0x83   : > { %3217 = shalt.err (!%p3214_p3)
}
  0x84   : > { %s3218_s15 = scalar_lea.vmem %s3706_s12, 2048  ;;  %s3401_s11 = smov [#allocation8]  }
  0x85   : > { %p3219_p9 = scmp.ne.s32.totalorder %s3706_s12, %s3218_s15  ;;  %s3223_s26 = sshll.u32 %s3401_s11, 4  ;;  %s3224_s26 = int_to_ptr.vmem [resolvable:$false] %s3223_s26 }
  0x86   : > { %s3225_s4 = scalar_lea.vmem %s3224_s26, 4096  ;;  %p3226_p2 = scmp.lt.s32.totalorder %s3706_s12, %s3224_s26 }
  0x87   : > { %p3221_p0 = pnand %p3219_p9, %p3628_p6  ;;  %p3227_p13 = scmp.lt.s32.totalorder %s3225_s4, %s3218_s15 }
  0x89   : > { %p3222_p1 = pneg %p3221_p0  ;;  %p3228_p7 = por %p3227_p13, %p3226_p2 }
  0x8b   : > { %p3229_p10 = pnand %p3228_p7, %p3222_p1 }
  0x8d   : > { %3232 = shalt.err (!%p3229_p10)
}
  0x8e   : > { %s3402_s3 = smov 128   ;;  %s3403_s7 = smov 8  }
  0x8f   : > { %2874 = dma.hbm_to_vmem [thread:$0]  (!%p3608_p4), %s3702_s0, 2048, %s3706_s12, %s3622_s13, %s3402_s3, %s3402_s3, %s3403_s7  }
  0x90   : > { %s4243_s10 = sld [smem:[#allocation36_spill]]  ;;  %s614_s15 = scalar_lea.vmem [#allocation9], %s2557_s14 }
  0x91   : > { %s621_s11 = sshll.u32 %s614_s15, 4  ;;  %s611_s26 = scalar_lea.sflag [#allocation10], %s3599_s16  ;;  %s3739_s11 = int_to_ptr.vmem [resolvable:$true] %s621_s11 }
  0x96   : > { %s3735_s23 = scalar_lea.hbm %s4243_s10, %s2665_s30  ;;  %s3238_s30 = scalar_lea.hbm %s4243_s10, 4096 }
  0x97   : > { %s3233_s4 = scalar_lea.hbm %s3735_s23, 2048  ;;  %p3239_p12 = scmp.lt.u32.totalorder %s3735_s23, %s4243_s10 }
  0x98   : > { %p3234_p5 = scmp.ne.s32.totalorder %s3735_s23, %s3233_s4  ;;  %p3240_p3 = scmp.lt.u32.totalorder %s3238_s30, %s3233_s4 }
  0x99   : > { %p3242_p0 = scmp.lt.u32.totalorder %s3233_s4, %s3735_s23 }
  0x9a   : > { %p3236_p11 = pnand %p3234_p5, %p3628_p6  ;;  %p3241_p9 = por %p3240_p3, %p3239_p12 }
  0x9c   : > { %p3237_p8 = pneg %p3236_p11  ;;  %p3243_p1 = por %p3242_p0, %p3241_p9 }
  0x9e   : > { %p3244_p2 = pnand %p3243_p1, %p3237_p8 }
  0xa0   : > { %3247 = shalt.err (!%p3244_p2)
}
  0xa1   : > { %s3248_s14 = scalar_lea.vmem %s3739_s11, 2048  ;;  %s3404_s7 = smov [#allocation9]  }
  0xa2   : > { %p3249_p13 = scmp.ne.s32.totalorder %s3739_s11, %s3248_s14  ;;  %s3253_s18 = sshll.u32 %s3404_s7, 4  ;;  %s3254_s18 = int_to_ptr.vmem [resolvable:$false] %s3253_s18 }
  0xa3   : > { %s3255_s21 = scalar_lea.vmem %s3254_s18, 4096  ;;  %p3256_p5 = scmp.lt.s32.totalorder %s3739_s11, %s3254_s18 }
  0xa4   : > { %p3251_p7 = pnand %p3249_p13, %p3628_p6  ;;  %p3257_p11 = scmp.lt.s32.totalorder %s3255_s21, %s3248_s14 }
  0xa6   : > { %p3252_p10 = pneg %p3251_p7  ;;  %p3258_p12 = por %p3257_p11, %p3256_p5 }
  0xa8   : > { %p3259_p3 = pnand %p3258_p12, %p3252_p10 }
  0xaa   : > { %3262 = shalt.err (!%p3259_p3)
}
  0xab   : > { %s4244_s15 = smov 4   ;;  %s4245_s4 = smov 64  }
  0xac   : > { %2877 = dma.hbm_to_vmem [thread:$0]  (!%p3608_p4), %s3735_s23, 2048, %s3739_s11, %s611_s26, %s4245_s4, %s4245_s4, %s4244_s15  }
  0xad   : > { %p4246_p6 = scmp.ne.s32.totalorder %s4240_s9, 0 }
  0xae   : > { %s641_s24 = sand.u32 (!%p4246_p6), 1, %s3369_s25   ;;  %p4247_p8 = scmp.ne.s32.totalorder (!%p4246_p6), %s4230_s19, 0 }
  0xaf   : > { %639 = sbr.rel (%p4246_p6) target bundleno = 3984 (0xf90), region = 84  ;;  %s642_s0 = scalar_lea.sflag (!%p4246_p6), [#allocation4], %s641_s24 }
  0xb0   : > { %s2854_s13 = smul.u32 (!%p4246_p6), 192, %s641_s24 }
  0xb2   : > { %s3771_s30 = scalar_lea.vmem (!%p4246_p6), [#allocation3], %s2854_s13 }
  0xb6   : > { %3336 = dma.done.wait (%p4247_p8), %s642_s0, 3072  }
  0xb7   : > { %3338 = vsyncadd (%p4247_p8), %s642_s0, 4294964224  ;;  %s650_s20 = sand.u32 1, %s3553_s17   ;;  %s2564_s16 = sshll.u32 %s641_s24, 6 }
  0xb8   : > { %s651_s23 = scalar_lea.sflag [#allocation7], %s650_s20  ;;  %s3778_s11 = scalar_lea.vmem [#allocation6], %s2564_s16 }
  0xb9   : > { %3340 = dma.done.wait (%p4247_p8), %s651_s23, 3072  }
  0xba   : > { %3342 = vsyncadd (%p4247_p8), %s651_s23, 4294964224  ;;  %s2565_s9 = sshll.u32 %s641_s24, 7  ;;  %s669_s12 = scalar_lea.sflag [#allocation10], %s641_s24 }
  0xbb   : > { %s3784_s26 = scalar_lea.vmem [#allocation8], %s2565_s9  ;;  %s3786_s3 = scalar_lea.vmem [#allocation9], %s2565_s9 }
  0xbc   : > { %3344 = dma.done.wait (%p4247_p8), %s669_s12, 2048  }
  0xbd   : > { %3346 = vsyncadd (%p4247_p8), %s669_s12, 4294965248  ;;  %p762_p4 = scmp.lt.s32.totalorder %s3381_s28, 1  ;;  %p767_p9 = scmp.lt.s32.totalorder %s3377_s27, 1 }
  0xbe   : > { %s4248_s15 = sld [smem:[#allocation30_spill]]  ;;  %s4249_s18 = sld [smem:[#allocation33_spill]] }
  0xbf   : > { %s763_s14 = scalar_select %p762_p4, %s3381_s28, 1 }
  0xc0   : > { %s3797_s7 = scalar_select %p767_p9, %s3377_s27, 1 }
  0xc1   : > { %s2667_s19 = sshll.u32 %s763_s14, 4  ;;  %s4250_s13 = sld [smem:[#allocation37_spill]] }
  0xc2   : > { %s775_s17 = scalar_lea.vmem %s4172_s5, %s3797_s7  ;;  %s778_s14 = scalar_lea.vmem %s4173_s6, %s3797_s7 }
  0xc3   : > { %s2569_s21 = sshll.u32 %s3797_s7, 1  ;;  %s4251_s16 = sld [smem:[#allocation35_spill]] }
  0xc4   : > { %s766_s4 = scalar_lea.vmem %s4248_s15, %s2667_s19  ;;  %s781_s19 = scalar_lea.vmem %s4249_s18, %s3797_s7 }
  0xc5   : > { %s4252_s9 = sand.u32 1, %s3357_s22   ;;  %p2570_p0 = scmp.ne.s32.totalorder %s3377_s27, 0 }
  0xc6   : > { %s3834_s12 = scalar_lea.vmem [#allocation11], %s4252_s9  ;;  %v794_v0 = vld [vmem:[%s766_s4] sm:$0xff] (!%p2570_p0)  ;;  %v795_v1 = vld [vmem:[%s766_s4 + $0x8] sm:$0xff] (!%p2570_p0) }
  0xc7   : > { %s788_s0 = scalar_lea.vmem %s4250_s13, %s3797_s7  ;;  %793 = sbr.rel (%p2570_p0) target bundleno = 206 (0xce), region = 104  ;;  %796 = vst [vmem:[#allocation2] sm:$0xff] (!%p2570_p0), %v794_v0  ;;  %797 = vst [vmem:[#allocation2 + $0x8] sm:$0xff] (!%p2570_p0), %v795_v1 }
  0xc9   : > { %s3830_s23 = scalar_lea.vmem %s4251_s16, %s2569_s21 }
  0xce PF: > { %v3837_v2 = vld [vmem:[#allocation2] sm:$0xff]  ;;  %v3839_v3 = vld [vmem:[#allocation2 + $0x8] sm:$0xff]  ;;  %v3003_v5 = vld [vmem:[%s3771_s30] ss:$12 sps:$4 sm:$0xff]   ;;  %v3405_v6 = vmov 0.0   ;;  %v3406_v32 = vmov 0   ;;  %s4253_s25 = scalar_lea.vmem %s4168_s1, %s3797_s7 }
  0xcf   : > { %802 = vadd.xlane.f32.xlu0 %v3837_v2  ;;  %v3001_v4 = vld [vmem:[%s3771_s30 + $0x4] ss:$12 sps:$4 sm:$0xff]   ;;  %2736 = vmatprep.subr.bf16.mxu1 %v3405_v6  ;;  %v3004_v7 = vld [vmem:[%s3771_s30 + $0x8] ss:$12 sps:$4 sm:$0xff]   ;;  %v3008_v18 = vld [vmem:[%s3771_s30 + $0x20] ss:$12 sps:$4 sm:$0xff]  }
  0xd0   : > { %v3005_v8 = vld [vmem:[%s3771_s30 + $0x1c] ss:$12 sps:$4 sm:$0xff]   ;;  %1002 = vmatprep.subr.bf16.mxu0 %v3001_v4  ;;  %2737 = vmatpush3.bf16.msra.mxu1 %v3004_v7  ;;  %v3007_v17 = vld [vmem:[%s3771_s30 + $0x18] ss:$12 sps:$4 sm:$0xff]   ;;  %v3009_v19 = vld [vmem:[%s3771_s30 + $0x34] ss:$12 sps:$4 sm:$0xff]  }
  0xd1   : > { %1003 = vmatpush1.bf16.msra.mxu0 %v3003_v5  ;;  %2738 = vmatprep.subr.bf16.mxu1 %v3405_v6  ;;  %v3011_v20 = vld [vmem:[%s3771_s30 + $0x30] ss:$12 sps:$4 sm:$0xff]   ;;  %v3012_v21 = vld [vmem:[%s3771_s30 + $0x38] ss:$12 sps:$4 sm:$0xff]   ;;  %v3015_v23 = vld [vmem:[%s3771_s30 + $0x48] ss:$12 sps:$4 sm:$0xff]  }
  0xd2   : > { %1004 = vmatprep.subr.bf16.mxu0 %v3005_v8  ;;  %v3013_v22 = vld [vmem:[%s3771_s30 + $0x4c] ss:$12 sps:$4 sm:$0xff]   ;;  %v3016_v24 = vld [vmem:[%s3771_s30 + $0x50] ss:$12 sps:$4 sm:$0xff]   ;;  %v3020_v27 = vld [vmem:[%s3771_s30 + $0x68] ss:$12 sps:$4 sm:$0xff]   ;;  %1034 = vmatprep.mubr.bf16.mxu0 %v3406_v32 }
  0xd3   : > { %804 = vadd.xlane.f32.xlu0 %v3839_v3  ;;  %v3017_v25 = vld [vmem:[%s3771_s30 + $0x64] ss:$12 sps:$4 sm:$0xff]   ;;  %v3019_v26 = vld [vmem:[%s3771_s30 + $0x60] ss:$12 sps:$4 sm:$0xff]   ;;  %v3021_v28 = vld [vmem:[%s3771_s30 + $0x7c] ss:$12 sps:$4 sm:$0xff]  }
  0xd4   : > { %2739 = vmatpush3.bf16.msra.mxu1 %v3008_v18  ;;  %v3023_v29 = vld [vmem:[%s3771_s30 + $0x78] ss:$12 sps:$4 sm:$0xff]   ;;  %v3024_v30 = vld [vmem:[%s3771_s30 + $0x80] ss:$12 sps:$4 sm:$0xff]   ;;  %vm3407_vm0 = vmmov 0   ;;  %vm1091_vm1 = vcmask 261120  }
  0xd5   : > { %1005 = vmatpush1.bf16.msra.mxu0 %v3007_v17  ;;  %2740 = vmatprep.subr.bf16.mxu1 %v3405_v6  ;;  %v3025_v31 = vld [vmem:[%s3771_s30 + $0x94] ss:$12 sps:$4 sm:$0xff]   ;;  %v3027_v33 = vld [vmem:[%s3771_s30 + $0x90] ss:$12 sps:$4 sm:$0xff]   ;;  %v3028_v34 = vld [vmem:[%s3771_s30 + $0x98] ss:$12 sps:$4 sm:$0xff]  }
  0xd6   : > { %1006 = vmatprep.subr.bf16.mxu0 %v3009_v19  ;;  %2752 = vmatprep.mubr.msk.bf16.mxu1 %vm3407_vm0, %v3405_v6  ;;  %v3029_v35 = vld [vmem:[%s3771_s30 + $0xac] ss:$12 sps:$4 sm:$0xff]   ;;  %v3031_v36 = vld [vmem:[%s3771_s30 + $0xa8] ss:$12 sps:$4 sm:$0xff]   ;;  %v3032_v37 = vld [vmem:[%s3771_s30 + $0xb0] ss:$12 sps:$4 sm:$0xff]   ;;  %s4254_s30 = scalar_lea.vmem %s4169_s2, %s3797_s7 }
  0xd7   : > { %v2571_v46 = vld [vmem:[%s4253_s25] ss:$0 sm:$0xff]  ;;  %vm1139_vm2 = vcmask 130048   ;;  %s3408_s4 = smov 96   ;;  %s3409_s18 = smov 64   ;;  %vm1599_vm3 = vcmask 523264  }
  0xd8   : > { %2741 = vmatpush3.bf16.msra.mxu1 %v3012_v21  ;;  %v2572_v50 = vld [vmem:[%s4254_s30] ss:$0 sm:$0xff]  ;;  %s3410_s21 = smov 32   ;;  %vm1602_vm4 = vcmask 785408   ;;  %p2649_p1 = scmp.ne.s32.totalorder %s3377_s27, 1 }
  0xd9   : > { %1007 = vmatpush1.bf16.msra.mxu0 %v3011_v20  ;;  %2742 = vmatprep.subr.bf16.mxu1 %v3405_v6  ;;  %s4257_s7 = sld [smem:[#allocation38_spill]] (!%p2649_p1)  ;;  %vm3412_vm5 = vmmov (!%p2649_p1), 0   ;;  %s4261_s9 = sld [smem:[#allocation41_spill]] (!%p2649_p1)  ;;  %vm2302_vm6 = vcmask (!%p2649_p1), 8192  }
  0xda   : > { %1008 = vmatprep.subr.bf16.mxu0 %v3013_v22 }
  0xdc   : > { %2743 = vmatpush3.bf16.msra.mxu1 %v3016_v24 }
  0xdd   : > { %1009 = vmatpush1.bf16.msra.mxu0 %v3015_v23  ;;  %2744 = vmatprep.subr.bf16.mxu1 %v3405_v6 }
  0xde   : > { %1010 = vmatprep.subr.bf16.mxu0 %v3017_v25 }
  0xe0   : > { %2745 = vmatpush3.bf16.msra.mxu1 %v3020_v27 }
  0xe1   : > { %1011 = vmatpush1.bf16.msra.mxu0 %v3019_v26  ;;  %2746 = vmatprep.subr.bf16.mxu1 %v3405_v6 }
  0xe2   : > { %1012 = vmatprep.subr.bf16.mxu0 %v3021_v28 }
  0xe4   : > { %2747 = vmatpush3.bf16.msra.mxu1 %v3024_v30 }
  0xe5   : > { %1013 = vmatpush1.bf16.msra.mxu0 %v3023_v29  ;;  %2748 = vmatprep.subr.bf16.mxu1 %v3405_v6 }
  0xe6   : > { %1014 = vmatprep.subr.bf16.mxu0 %v3025_v31 }
  0xe8   : > { %2749 = vmatpush3.bf16.msra.mxu1 %v3028_v34 }
  0xe9   : > { %1015 = vmatpush1.bf16.msra.mxu0 %v3027_v33  ;;  %2750 = vmatprep.subr.bf16.mxu1 %v3405_v6 }
  0xea   : > { %1016 = vmatprep.subr.bf16.mxu0 %v3029_v35 }
  0xec   : > { %2751 = vmatpush3.bf16.msra.mxu1 %v3032_v37 }
  0xed   : > { %1017 = vmatpush1.bf16.msra.mxu0 %v3031_v36  ;;  %2756 = vmatprep.subr.bf16.mxu1 %v3405_v6 }
  0xee   : > { %2780 = vmatprep.subr.bf16.mxu0 %v3405_v6 }
 0x15c   : > { %v803_v9 = vpop.xlane.xlu0 %802 }
 0x15d   : > { %v807_v10 = vmul.f32 0.0078125, %v803_v9 }
 0x15f   : > { %v3850_v11 = vsub.f32 %v3837_v2, %v807_v10 }
 0x160   : > { %v805_v12 = vpop.xlane.xlu0 %804 }
 0x161   : > { %v808_v13 = vmul.f32 0.0078125, %v805_v12  ;;  %v811_v14 = vmul.f32 %v3850_v11, %v3850_v11 }
 0x163   : > { %v3855_v15 = vsub.f32 %v3839_v3, %v808_v13  ;;  %813 = vadd.xlane.f32.xlu1 %v811_v14 }
 0x165   : > { %v812_v16 = vmul.f32 %v3855_v15, %v3855_v15 }
 0x167   : > { %815 = vadd.xlane.f32.xlu1 %v812_v16 }
 0x1f0   : > { %v814_v38 = vpop.xlane.xlu1 %813 }
 0x1f1   : > { %v817_v39 = vmul.f32 0.0078125, %v814_v38 }
 0x1f3   : > { %v819_v40 = vadd.f32 1e-05, %v817_v39 }
 0x1f4   : > { %v816_v41 = vpop.xlane.xlu1 %815 }
 0x1f5   : > { %3081 = vrsqrt.f32 %v819_v40  ;;  %v818_v42 = vmul.f32 0.0078125, %v816_v41 }
 0x1f7   : > { %v820_v43 = vadd.f32 1e-05, %v818_v42 }
 0x1f9   : > { %3083 = vrsqrt.f32 %v820_v43 }
 0x1ff   : > { %v3082_v44 = vpop.eup %3081 }
 0x200   : > { %v823_v45 = vmul.f32 %v3082_v44, %v3850_v11 }
 0x202   : > { %v831_v49 = vmul.f32 %v2571_v46, %v823_v45 }
 0x203   : > { %v3084_v47 = vpop.eup %3083 }
 0x204   : > { %v824_v48 = vmul.f32 %v3084_v47, %v3855_v15  ;;  %v839_v52 = vadd.f32 %v2572_v50, %v831_v49 }
 0x206   : > { %v832_v51 = vmul.f32 %v2571_v46, %v824_v48 }
 0x208   : > { %v840_v53 = vadd.f32 %v2572_v50, %v832_v51 }
 0x20a   : > { %v841_v54 = vpack.c.bf16 %v840_v53, %v839_v52 }
 0x20c   : > { %1035 = vmatmul.mubr.bf16.vlgmr.msra.gmra.mrb[0].mxu0 %v841_v54  ;;  %2753 = vmatmul.mubr.bf16.vlgmr.msra.gmra.mrb[0].mxu1 %v841_v54 }
 0x20d   : > { %2758 = vmatprep.mubr.msk.bf16.mxu1 %vm3407_vm0, %v3405_v6  ;;  %2782 = vmatprep.mubr.msk.bf16.mxu0 %vm3407_vm0, %v3405_v6 }
 0x2df   : > { %v1036_v55 = vpop.f32.mrb[0].mxu0  ;;  %v1079_v56 = vpop.f32.mrb[0].mxu1 }
 0x2e0   : > { %v1038_v57 = vpop.f32.mrb[1].mxu0  ;;  %v2754_v58 = vpop.f32.mrb[1].mxu1  ;;  %v1086_v61 = vmul.f32 0.17677669, %v1036_v55 }
 0x2e1   : > { %v1040_v59 = vpop.f32.mrb[2].mxu0  ;;  %v1082_v60 = vpop.f32.mrb[2].mxu1 }
 0x2e2   : > { %v1087_v62 = vmul.f32 0.17677669, %v1040_v59  ;;  %v3906_v63 = vpack.c.bf16 %v1082_v60, %v1079_v56  ;;  %v1042_v0 = vpop.f32.mrb[3].mxu0  ;;  %v2755_v1 = vpop.f32.mrb[3].mxu1 }
 0x2e3   : > { %v1089_v4 = vpack.c.bf16 %v1042_v0, %v1038_v57 }
 0x2e4   : > { %v1088_v5 = vpack.c.bf16 %v1087_v62, %v1086_v61 }
 0x2e5   : > { %v1096_v7 = vsel %vm1091_vm1, %v1089_v4, 0 }
 0x2e6   : > { %2757 = vmatpush3.bf16.xpose.msra.mxu1 %v1096_v7 }
 0x2e7   : > { %2762 = vmatprep.subr.bf16.mxu1 %v3405_v6 }
 0x2ed   : > { %2759 = vmatmul.mubr.msk.bf16.vlgmr.msra.gmra.mrb[4].mxu1 %vm1091_vm1, %v1088_v5 }
 0x2ee   : > { %2763 = vmatpush3.bf16.msra.mxu1 %v3906_v63  ;;  %2764 = vmatprep.mubr.msk.bf16.mxu1 %vm3407_vm0, %v3405_v6 }
 0x2ef   : > { %2768 = vmatprep.subr.bf16.mxu1 %v3405_v6 }
 0x3c0   : > { %v1132_v8 = vpop.f32.mrb[4].mxu1 }
 0x3c1   : > { %v2760_v9 = vpop.f32.mrb[5].mxu1  ;;  %v1140_v10 = vsel %vm1139_vm2, %v1132_v8, -inf }
 0x3c2   : > { %1141 = vmax.xlane.f32.xlu0 %v1140_v10  ;;  %v1135_v11 = vpop.f32.mrb[6].mxu1 }
 0x3c3   : > { %v2761_v12 = vpop.f32.mrb[7].mxu1  ;;  %v1143_v13 = vsel %vm1139_vm2, %v1135_v11, -inf }
 0x3c4   : > { %1144 = vmax.xlane.f32.xlu1 %v1143_v13 }
 0x44f   : > { %v1142_v14 = vpop.xlane.xlu0 %1141 }
 0x450   : > { %v1146_v15 = vsub.f32 %v1132_v8, %v1142_v14 }
 0x451   : > { %v1145_v16 = vpop.xlane.xlu1 %1144 }
 0x452   : > { %v1148_v17 = vmul.f32 1.442695, %v1146_v15  ;;  %v1147_v18 = vsub.f32 %v1135_v11, %v1145_v16 }
 0x454   : > { %3085 = vpow2.f32 %v1148_v17  ;;  %v1150_v19 = vmul.f32 1.442695, %v1147_v18 }
 0x456   : > { %3087 = vpow2.f32 %v1150_v19 }
 0x45e   : > { %v3086_v20 = vpop.eup %3085 }
 0x45f   : > { %v1152_v21 = vsel %vm1139_vm2, %v3086_v20, 0.0 }
 0x460   : > { %v3088_v22 = vpop.eup %3087  ;;  %1153 = vadd.xlane.f32.xlu0 %v1152_v21 }
 0x461   : > { %v1155_v23 = vsel %vm1139_vm2, %v3088_v22, 0.0 }
 0x462   : > { %1156 = vadd.xlane.f32.xlu1 %v1155_v23 }
 0x473   : > { %1208 = vrot.lane.b32.xlu1 %v1088_v5, %s3408_s4 }
 0x476   : > { %1211 = vrot.lane.b32.xlu0 %v1089_v4, %s3408_s4 }
 0x477   : > { %1333 = vrot.lane.b32.xlu1 %v1089_v4, %s3409_s18 }
 0x47a   : > { %1454 = vrot.lane.b32.xlu0 %v1089_v4, %s3410_s21 }
 0x47b   : > { %1331 = vrot.lane.b32.xlu1 %v1088_v5, %s3409_s18 }
 0x47f   : > { %1452 = vrot.lane.b32.xlu1 %v1088_v5, %s3410_s21 }
 0x4ed   : > { %v1154_v24 = vpop.xlane.xlu0 %1153 }
 0x4ee   : > { %3089 = vrcp.f32 %v1154_v24 }
 0x4ef   : > { %v1157_v25 = vpop.xlane.xlu1 %1156 }
 0x4f0   : > { %3091 = vrcp.f32 %v1157_v25 }
 0x4f1   : > { %v1212_v27 = vpop.permute.xlu0 %1211 }
 0x4f2   : > { %v1217_v37 = vsel %vm1091_vm1, %v1212_v27, 0 }
 0x4f3   : > { %v1209_v26 = vpop.permute.xlu1 %1208 }
 0x4f5   : > { %v1455_v35 = vpop.permute.xlu0 %1454 }
 0x4f6   : > { %v1460_v39 = vsel %vm1091_vm1, %v1455_v35, 0 }
 0x4f7   : > { %v1334_v28 = vpop.permute.xlu1 %1333 }
 0x4f8   : > { %v3090_v29 = vpop.eup %3089  ;;  %v1339_v30 = vsel %vm1091_vm1, %v1334_v28, 0 }
 0x4f9   : > { %2781 = vmatpush3.bf16.xpose.msra.mxu0 %v1339_v30  ;;  %v1160_v33 = vmul.f32 %v3090_v29, %v3086_v20 }
 0x4fa   : > { %v3092_v31 = vpop.eup %3091  ;;  %2792 = vmatprep.subr.bf16.mxu0 %v3405_v6 }
 0x4fb   : > { %v1161_v34 = vmul.f32 %v3092_v31, %v3088_v22  ;;  %v1332_v38 = vpop.permute.xlu1 %1331 }
 0x4fd   : > { %v1162_v36 = vpack.c.bf16 %v1161_v34, %v1160_v33 }
 0x4ff   : > { %2765 = vmatmul.mubr.msk.bf16.vlgmr.msra.gmra.mrb[8].mxu1 %vm1139_vm2, %v1162_v36  ;;  %v1453_v40 = vpop.permute.xlu1 %1452 }
 0x500   : > { %2769 = vmatpush3.bf16.xpose.msra.mxu1 %v1217_v37  ;;  %2783 = vmatmul.mubr.msk.bf16.vlgmr.msra.gmra.mrb[4].mxu0 %vm1091_vm1, %v1332_v38 }
 0x501   : > { %2793 = vmatpush3.bf16.xpose.msra.mxu0 %v1460_v39  ;;  %2770 = vmatprep.mubr.msk.bf16.mxu1 %vm3407_vm0, %v3405_v6 }
 0x502   : > { %2794 = vmatprep.mubr.msk.bf16.mxu0 %vm3407_vm0, %v3405_v6  ;;  %2774 = vmatprep.subr.bf16.mxu1 %v3405_v6 }
 0x503   : > { %2804 = vmatprep.subr.bf16.mxu0 %v3405_v6 }
 0x507   : > { %2771 = vmatmul.mubr.msk.bf16.vlgmr.msra.gmra.mrb[12].mxu1 %vm1091_vm1, %v1209_v26 }
 0x508   : > { %2795 = vmatmul.mubr.msk.bf16.vlgmr.msra.gmra.mrb[8].mxu0 %vm1091_vm1, %v1453_v40  ;;  %2776 = vmatprep.mubr.msk.bf16.mxu1 %vm3407_vm0, %v3405_v6 }
 0x509   : > { %2820 = vmatprep.mubr.msk.bf16.mxu0 %vm3407_vm0, %v3405_v6 }
 0x5d2   : > { %v3943_v41 = vpop.f32.mrb[8].mxu1 }
 0x5d3   : > { %v2766_v42 = vpop.f32.mrb[9].mxu1  ;;  %v1375_v43 = vpop.f32.mrb[4].mxu0 }
 0x5d4   : > { %v3945_v44 = vpop.f32.mrb[10].mxu1  ;;  %v2784_v45 = vpop.f32.mrb[5].mxu0  ;;  %v1382_v59 = vsel %vm1139_vm2, %v1375_v43, -inf }
 0x5d5   : > { %v2767_v46 = vpop.f32.mrb[11].mxu1  ;;  %v1378_v47 = vpop.f32.mrb[6].mxu0 }
 0x5d6   : > { %v2785_v48 = vpop.f32.mrb[7].mxu0  ;;  %v1385_v61 = vsel %vm1139_vm2, %v1378_v47, -inf }
 0x5da   : > { %v1253_v49 = vpop.f32.mrb[12].mxu1 }
 0x5db   : > { %v2772_v50 = vpop.f32.mrb[13].mxu1  ;;  %v1496_v51 = vpop.f32.mrb[8].mxu0  ;;  %v1260_v52 = vsel %vm1139_vm2, %v1253_v49, -inf }
 0x5dc   : > { %v2796_v53 = vpop.f32.mrb[9].mxu0  ;;  %1261 = vmax.xlane.f32.xlu0 %v1260_v52  ;;  %v1256_v54 = vpop.f32.mrb[14].mxu1  ;;  %v1503_v62 = vsel %vm1139_vm2, %v1496_v51, -inf }
 0x5dd   : > { %v2773_v55 = vpop.f32.mrb[15].mxu1  ;;  %v1499_v56 = vpop.f32.mrb[10].mxu0  ;;  %v1263_v57 = vsel %vm1139_vm2, %v1256_v54, -inf }
 0x5de   : > { %v2797_v58 = vpop.f32.mrb[11].mxu0  ;;  %1264 = vmax.xlane.f32.xlu1 %v1263_v57  ;;  %v1506_v60 = vsel %vm1139_vm2, %v1499_v56, -inf }
 0x5e0   : > { %1383 = vmax.xlane.f32.xlu0 %v1382_v59  ;;  %v3033_v59 = vld [vmem:[%s3778_s11] sm:$0xff]  }
 0x5e1   : > { %2805 = vmatpush3.bf16.msra.mxu0 %v3033_v59  ;;  %v3055_v59 = vld [vmem:[%s3784_s26 + $0x44] ss:$8 sps:$4 sm:$0xff]  }
 0x5e2   : > { %1507 = vmax.xlane.f32.xlu1 %v1506_v60  ;;  %v3034_v60 = vld [vmem:[%s3778_s11 + $0x8] sm:$0xff]   ;;  %2806 = vmatprep.subr.bf16.mxu0 %v3405_v6 }
 0x5e4   : > { %1386 = vmax.xlane.f32.xlu0 %v1385_v61  ;;  %v3035_v61 = vld [vmem:[%s3778_s11 + $0x10] sm:$0xff]  }
 0x5e5   : > { %2807 = vmatpush3.bf16.msra.mxu0 %v3034_v60  ;;  %v3053_v60 = vld [vmem:[%s3784_s26 + $0x40] ss:$8 sps:$4 sm:$0xff]  }
 0x5e6   : > { %2808 = vmatprep.subr.bf16.mxu0 %v3405_v6 }
 0x5e8   : > { %1504 = vmax.xlane.f32.xlu0 %v1503_v62  ;;  %v3036_v62 = vld [vmem:[%s3778_s11 + $0x18] sm:$0xff]  }
 0x5e9   : > { %2809 = vmatpush3.bf16.msra.mxu0 %v3035_v61  ;;  %v3058_v61 = vld [vmem:[%s3784_s26 + $0x54] ss:$8 sps:$4 sm:$0xff]  }
 0x5ea   : > { %2810 = vmatprep.subr.bf16.mxu0 %v3405_v6 }
 0x5ed   : > { %2811 = vmatpush3.bf16.msra.mxu0 %v3036_v62  ;;  %v3056_v62 = vld [vmem:[%s3784_s26 + $0x50] ss:$8 sps:$4 sm:$0xff]  }
 0x5ee   : > { %2812 = vmatprep.subr.bf16.mxu0 %v3405_v6 }
 0x669   : > { %v1262_v0 = vpop.xlane.xlu0 %1261 }
 0x66a   : > { %v1266_v12 = vsub.f32 %v1253_v49, %v1262_v0  ;;  %v3037_v0 = vld [vmem:[%s3778_s11 + $0x20] sm:$0xff]  }
 0x66b   : > { %v1265_v1 = vpop.xlane.xlu1 %1264  ;;  %2813 = vmatpush3.bf16.msra.mxu0 %v3037_v0  ;;  %v3061_v0 = vld [vmem:[%s3784_s26 + $0x64] ss:$8 sps:$4 sm:$0xff]  }
 0x66c   : > { %v1267_v13 = vsub.f32 %v1256_v54, %v1265_v1  ;;  %v1268_v18 = vmul.f32 1.442695, %v1266_v12  ;;  %2814 = vmatprep.subr.bf16.mxu0 %v3405_v6  ;;  %v3040_v12 = vld [vmem:[%s3778_s11 + $0x38] sm:$0xff]  }
 0x66d   : > { %v1384_v4 = vpop.xlane.xlu0 %1383 }
 0x66e   : > { %v1388_v5 = vsub.f32 %v1375_v43, %v1384_v4  ;;  %v1270_v19 = vmul.f32 1.442695, %v1267_v13  ;;  %v3038_v4 = vld [vmem:[%s3778_s11 + $0x28] sm:$0xff]  }
 0x66f   : > { %v1508_v7 = vpop.xlane.xlu1 %1507  ;;  %2815 = vmatpush3.bf16.msra.mxu0 %v3038_v4  ;;  %v3062_v4 = vld [vmem:[%s3784_s26 + $0x70] ss:$8 sps:$4 sm:$0xff]  }
 0x670   : > { %v1390_v8 = vmul.f32 1.442695, %v1388_v5  ;;  %v1510_v9 = vsub.f32 %v1499_v56, %v1508_v7  ;;  %2816 = vmatprep.subr.bf16.mxu0 %v3405_v6 }
 0x671   : > { %v1387_v10 = vpop.xlane.xlu0 %1386 }
 0x672   : > { %3093 = vpow2.f32 %v1390_v8  ;;  %v1389_v11 = vsub.f32 %v1378_v47, %v1387_v10  ;;  %v1513_v14 = vmul.f32 1.442695, %v1510_v9  ;;  %v3039_v9 = vld [vmem:[%s3778_s11 + $0x30] sm:$0xff]  }
 0x673   : > { %2817 = vmatpush3.bf16.msra.mxu0 %v3039_v9 }
 0x674   : > { %v1392_v15 = vmul.f32 1.442695, %v1389_v11  ;;  %2818 = vmatprep.subr.bf16.mxu0 %v3405_v6 }
 0x675   : > { %v1505_v16 = vpop.xlane.xlu0 %1504 }
 0x676   : > { %3095 = vpow2.f32 %v1392_v15  ;;  %v1509_v17 = vsub.f32 %v1496_v51, %v1505_v16 }
 0x677   : > { %3097 = vpow2.f32 %v1513_v14  ;;  %2819 = vmatpush3.bf16.msra.mxu0 %v3040_v12 }
 0x678   : > { %v1511_v20 = vmul.f32 1.442695, %v1509_v17 }
 0x67a   : > { %3099 = vpow2.f32 %v1511_v20 }
 0x67b   : > { %3101 = vpow2.f32 %v1268_v18 }
 0x67c   : > { %v3094_v21 = vpop.eup %3093  ;;  %3103 = vpow2.f32 %v1270_v19 }
 0x67d   : > { %v1394_v22 = vsel %vm1139_vm2, %v3094_v21, 0.0 }
 0x67e   : > { %1395 = vadd.xlane.f32.xlu0 %v1394_v22 }
 0x680   : > { %v3096_v23 = vpop.eup %3095 }
 0x681   : > { %v1397_v24 = vsel %vm1139_vm2, %v3096_v23, 0.0  ;;  %v3098_v25 = vpop.eup %3097 }
 0x682   : > { %1398 = vadd.xlane.f32.xlu1 %v1397_v24  ;;  %v1518_v29 = vsel %vm1139_vm2, %v3098_v25, 0.0 }
 0x684   : > { %v3100_v26 = vpop.eup %3099 }
 0x685   : > { %v3102_v27 = vpop.eup %3101  ;;  %v1515_v28 = vsel %vm1139_vm2, %v3100_v26, 0.0 }
 0x686   : > { %v3104_v30 = vpop.eup %3103  ;;  %1516 = vadd.xlane.f32.xlu0 %v1515_v28  ;;  %1519 = vadd.xlane.f32.xlu1 %v1518_v29  ;;  %v1272_v31 = vsel %vm1139_vm2, %v3102_v27, 0.0 }
 0x687   : > { %v1275_v33 = vsel %vm1139_vm2, %v3104_v30, 0.0 }
 0x68a   : > { %1273 = vadd.xlane.f32.xlu0 %v1272_v31  ;;  %1276 = vadd.xlane.f32.xlu1 %v1275_v33 }
 0x69b   : > { %1405 = vrot.lane.b32.xlu1 %v3906_v63, %s3409_s18 }
 0x69f   : > { %1526 = vrot.lane.b32.xlu1 %v3906_v63, %s3410_s21 }
 0x6a0   : > { %1284 = vrot.lane.b32.xlu0 %v3906_v63, %s3408_s4 }
 0x70b   : > { %v1396_v34 = vpop.xlane.xlu0 %1395 }
 0x70f   : > { %v1399_v35 = vpop.xlane.xlu1 %1398 }
 0x713   : > { %v1517_v36 = vpop.xlane.xlu0 %1516  ;;  %v1520_v37 = vpop.xlane.xlu1 %1519 }
 0x717   : > { %v1274_v38 = vpop.xlane.xlu0 %1273  ;;  %v1277_v39 = vpop.xlane.xlu1 %1276 }
 0x718   : > { %3105 = vrcp.f32 %v1274_v38 }
 0x719   : > { %3107 = vrcp.f32 %v1277_v39 }
 0x71a   : > { %3109 = vrcp.f32 %v1399_v35 }
 0x71b   : > { %v1285_v40 = vpop.permute.xlu0 %1284  ;;  %3111 = vrcp.f32 %v1396_v34  ;;  %v1406_v48 = vpop.permute.xlu1 %1405 }
 0x71c   : > { %2775 = vmatpush3.bf16.msra.mxu1 %v1285_v40  ;;  %3113 = vrcp.f32 %v1517_v36 }
 0x71d   : > { %2786 = vmatprep.subr.bf16.mxu1 %v3405_v6  ;;  %3115 = vrcp.f32 %v1520_v37  ;;  %v2605_v37 = vld [vmem:[%s775_s17] ss:$0 sm:$0xff] }
 0x71f   : > { %v1527_v55 = vpop.permute.xlu1 %1526 }
 0x722   : > { %v3106_v42 = vpop.eup %3105 }
 0x723   : > { %v3108_v43 = vpop.eup %3107  ;;  %v1280_v45 = vmul.f32 %v3106_v42, %v3102_v27 }
 0x724   : > { %v1281_v46 = vmul.f32 %v3108_v43, %v3104_v30  ;;  %v3110_v47 = vpop.eup %3109 }
 0x725   : > { %v3112_v49 = vpop.eup %3111  ;;  %v1403_v50 = vmul.f32 %v3110_v47, %v3096_v23  ;;  %v3046_v47 = vld [vmem:[%s3784_s26 + $0x14] ss:$8 sps:$4 sm:$0xff]  }
 0x726   : > { %v1282_v63 = vpack.c.bf16 %v1281_v46, %v1280_v45  ;;  %v1402_v51 = vmul.f32 %v3112_v49, %v3094_v21  ;;  %v3114_v52 = vpop.eup %3113  ;;  %v3041_v46 = vld [vmem:[%s3784_s26] ss:$8 sps:$4 sm:$0xff]  }
 0x727   : > { %v3116_v54 = vpop.eup %3115  ;;  %v1523_v56 = vmul.f32 %v3114_v52, %v3100_v26 }
 0x728   : > { %2777 = vmatmul.mubr.msk.bf16.vlgmr.msra.gmra.mrb[16].mxu1 %vm1139_vm2, %v1282_v63  ;;  %v1404_v53 = vpack.c.bf16 %v1403_v50, %v1402_v51  ;;  %v1524_v57 = vmul.f32 %v3116_v54, %v3098_v25  ;;  %v3043_v63 = vld [vmem:[%s3784_s26 + $0x4] ss:$8 sps:$4 sm:$0xff]  }
 0x729   : > { %2787 = vmatpush3.bf16.msra.mxu1 %v1406_v48  ;;  %2788 = vmatprep.mubr.msk.bf16.mxu1 %vm3407_vm0, %v3405_v6  ;;  %v3044_v48 = vld [vmem:[%s3784_s26 + $0x10] ss:$8 sps:$4 sm:$0xff]  }
 0x72a   : > { %2798 = vmatprep.subr.bf16.mxu1 %v3405_v6  ;;  %v1525_v58 = vpack.c.bf16 %v1524_v57, %v1523_v56  ;;  %v3047_v56 = vld [vmem:[%s3784_s26 + $0x20] ss:$8 sps:$4 sm:$0xff]   ;;  %v3052_v57 = vld [vmem:[%s3784_s26 + $0x34] ss:$8 sps:$4 sm:$0xff]  }
 0x730   : > { %2789 = vmatmul.mubr.msk.bf16.vlgmr.msra.gmra.mrb[20].mxu1 %vm1139_vm2, %v1404_v53 }
 0x731   : > { %2799 = vmatpush3.bf16.msra.mxu1 %v1527_v55  ;;  %2800 = vmatprep.mubr.msk.bf16.mxu1 %vm3407_vm0, %v3405_v6  ;;  %v3049_v55 = vld [vmem:[%s3784_s26 + $0x24] ss:$8 sps:$4 sm:$0xff]  }
 0x732   : > { %1869 = vmatprep.subr.bf16.mxu1 %v3043_v63 }
 0x738   : > { %2801 = vmatmul.mubr.msk.bf16.vlgmr.msra.gmra.mrb[24].mxu1 %vm1139_vm2, %v1525_v58  ;;  %v3050_v58 = vld [vmem:[%s3784_s26 + $0x30] ss:$8 sps:$4 sm:$0xff]  }
 0x739   : > { %1901 = vmatprep.mubr.bf16.mxu1 %v3406_v32  ;;  %1870 = vmatpush1.bf16.msra.mxu1 %v3041_v46 }
 0x73a   : > { %1871 = vmatprep.subr.bf16.mxu1 %v3046_v47 }
 0x73d   : > { %1872 = vmatpush1.bf16.msra.mxu1 %v3044_v48 }
 0x73e   : > { %1873 = vmatprep.subr.bf16.mxu1 %v3049_v55 }
 0x741   : > { %1874 = vmatpush1.bf16.msra.mxu1 %v3047_v56 }
 0x742   : > { %1875 = vmatprep.subr.bf16.mxu1 %v3052_v57 }
 0x745   : > { %1876 = vmatpush1.bf16.msra.mxu1 %v3050_v58 }
 0x746   : > { %1877 = vmatprep.subr.bf16.mxu1 %v3055_v59 }
 0x749   : > { %1878 = vmatpush1.bf16.msra.mxu1 %v3053_v60 }
 0x74a   : > { %1879 = vmatprep.subr.bf16.mxu1 %v3058_v61 }
 0x74d   : > { %1880 = vmatpush1.bf16.msra.mxu1 %v3056_v62 }
 0x74e   : > { %1881 = vmatprep.subr.bf16.mxu1 %v3061_v0 }
 0x7fb   : > { %v1324_v32 = vpop.f32.mrb[16].mxu1 }
 0x7fc   : > { %v2778_v1 = vpop.f32.mrb[17].mxu1 }
 0x7fd   : > { %v1327_v5 = vpop.f32.mrb[18].mxu1  ;;  %v3064_v1 = vld [vmem:[%s3784_s26 + $0x74] ss:$8 sps:$4 sm:$0xff]  }
 0x7fe   : > { %v2986_v7 = vpack.i.bf16 %v1327_v5, %v1324_v32  ;;  %v2779_v8 = vpop.f32.mrb[19].mxu1  ;;  %v3059_v32 = vld [vmem:[%s3784_s26 + $0x60] ss:$8 sps:$4 sm:$0xff]   ;;  %s4258_s26 = sld [smem:[#allocation40_spill]] (!%p2649_p1) }
 0x7ff   : > { %1882 = vmatpush1.bf16.msra.mxu1 %v3059_v32 }
 0x800   : > { %2987 = vrot.lane.b32.xlu1 %v2986_v7, %s3410_s21  ;;  %1883 = vmatprep.subr.bf16.mxu1 %v3064_v1 }
 0x803   : > { %v1445_v10 = vpop.f32.mrb[20].mxu1  ;;  %1884 = vmatpush1.bf16.msra.mxu1 %v3062_v4 }
 0x804   : > { %v2790_v11 = vpop.f32.mrb[21].mxu1  ;;  %s4259_s13 = smov (!%p2649_p1), %s4258_s26 }
 0x805   : > { %v1448_v13 = vpop.f32.mrb[22].mxu1 }
 0x806   : > { %v2991_v14 = vpack.i.bf16 %v1448_v13, %v1445_v10  ;;  %v2791_v15 = vpop.f32.mrb[23].mxu1 }
 0x808   : > { %2992 = vrot.lane.b32.xlu0 %v2991_v14, %s3409_s18  ;;  %v2614_v14 = vld [vmem:[%s778_s14] ss:$0 sm:$0xff] }
 0x80b   : > { %v1566_v16 = vpop.f32.mrb[24].mxu1 }
 0x80c   : > { %v2802_v17 = vpop.f32.mrb[25].mxu1 }
 0x80d   : > { %v1569_v18 = vpop.f32.mrb[26].mxu1 }
 0x80e   : > { %v2996_v19 = vpack.i.bf16 %v1569_v18, %v1566_v16  ;;  %v2803_v20 = vpop.f32.mrb[27].mxu1  ;;  %v2615_v18 = vld [vmem:[%s781_s19] ss:$0 sm:$0xff]  ;;  %s4260_s19 = sld [smem:[#allocation39_spill]] (!%p2649_p1) }
 0x810   : > { %2997 = vrot.lane.b32.xlu1 %v2996_v19, %s3408_s4 }
 0x872   : > { %v2988_v21 = vpop.permute.xlu1 %2987 }
 0x873   : > { %v2990_v23 = vunpack.i.h.bf16 %v2988_v21  ;;  %v2989_v24 = vunpack.i.l.bf16 %v2988_v21 }
 0x875   : > { %v1598_v27 = vsel %vm1091_vm1, %v3945_v44, %v2990_v23  ;;  %v1597_v28 = vsel %vm1091_vm1, %v3943_v41, %v2989_v24  ;;  %v3065_v23 = vld [vmem:[%s3786_s3 + $0x40] sm:$0xff]  }
 0x876   : > { %v3066_v24 = vld [vmem:[%s3786_s3] sm:$0xff]   ;;  %2702 = vmatprep.subr.bf16.mxu0 %v3065_v23 }
 0x87a   : > { %v2993_v22 = vpop.permute.xlu0 %2992 }
 0x87b   : > { %v2995_v6 = vunpack.i.h.bf16 %v2993_v22  ;;  %v2994_v25 = vunpack.i.l.bf16 %v2993_v22 }
 0x87d   : > { %v1601_v31 = vsel %vm1599_vm3, %v1598_v27, %v2995_v6  ;;  %v1600_v33 = vsel %vm1599_vm3, %v1597_v28, %v2994_v25  ;;  %v3067_v6 = vld [vmem:[%s3786_s3 + $0x48] sm:$0xff]   ;;  %v3070_v27 = vld [vmem:[%s3786_s3 + $0x10] sm:$0xff]   ;;  %v3071_v28 = vld [vmem:[%s3786_s3 + $0x58] sm:$0xff]  }
 0x87e   : > { %v3068_v25 = vld [vmem:[%s3786_s3 + $0x8] sm:$0xff]  }
 0x882   : > { %v2998_v26 = vpop.permute.xlu1 %2997 }
 0x883   : > { %v3000_v29 = vunpack.i.h.bf16 %v2998_v26  ;;  %v2999_v30 = vunpack.i.l.bf16 %v2998_v26  ;;  %v3069_v26 = vld [vmem:[%s3786_s3 + $0x50] sm:$0xff]  }
 0x885   : > { %v1604_v34 = vsel %vm1602_vm4, %v1601_v31, %v3000_v29  ;;  %v1603_v35 = vsel %vm1602_vm4, %v1600_v33, %v2999_v30  ;;  %v3072_v29 = vld [vmem:[%s3786_s3 + $0x18] sm:$0xff]   ;;  %v3073_v30 = vld [vmem:[%s3786_s3 + $0x60] sm:$0xff]   ;;  %v3075_v33 = vld [vmem:[%s3786_s3 + $0x68] sm:$0xff]  }
 0x886   : > { %v1605_v36 = vpack.c.bf16 %v1604_v34, %v1603_v35  ;;  %v3074_v31 = vld [vmem:[%s3786_s3 + $0x20] sm:$0xff]   ;;  %v3076_v34 = vld [vmem:[%s3786_s3 + $0x28] sm:$0xff]   ;;  %v3077_v35 = vld [vmem:[%s3786_s3 + $0x70] sm:$0xff]  }
 0x888   : > { %2821 = vmatmul.mubr.bf16.vlgmr.msra.gmra.mrb[12].mxu0 %v1605_v36  ;;  %v3078_v36 = vld [vmem:[%s3786_s3 + $0x30] sm:$0xff]  }
 0x889   : > { %2703 = vmatpush3.bf16.msra.mxu0 %v3066_v24 }
 0x88a   : > { %2704 = vmatprep.subr.bf16.mxu0 %v3067_v6 }
 0x88d   : > { %2705 = vmatpush3.bf16.msra.mxu0 %v3068_v25 }
 0x88e   : > { %2706 = vmatprep.subr.bf16.mxu0 %v3069_v26 }
 0x891   : > { %2707 = vmatpush3.bf16.msra.mxu0 %v3070_v27 }
 0x892   : > { %2708 = vmatprep.subr.bf16.mxu0 %v3071_v28 }
 0x895   : > { %2709 = vmatpush3.bf16.msra.mxu0 %v3072_v29 }
 0x896   : > { %2710 = vmatprep.subr.bf16.mxu0 %v3073_v30  ;;  %v2632_v30 = vld [vmem:[%s788_s0] ss:$0 sm:$0xff] }
 0x899   : > { %2711 = vmatpush3.bf16.msra.mxu0 %v3074_v31 }
 0x89a   : > { %2712 = vmatprep.subr.bf16.mxu0 %v3075_v33 }
 0x89d   : > { %2713 = vmatpush3.bf16.msra.mxu0 %v3076_v34 }
 0x89e   : > { %2714 = vmatprep.subr.bf16.mxu0 %v3077_v35 }
 0x8a1   : > { %2715 = vmatpush3.bf16.msra.mxu0 %v3078_v36 }
 0x95b   : > { %v1711_v44 = vpop.f32.mrb[12].mxu0 }
 0x95c   : > { %v1712_v38 = vadd.f32 %v2605_v37, %v1711_v44  ;;  %v2822_v41 = vpop.f32.mrb[13].mxu0  ;;  %v3080_v44 = vld [vmem:[%s3786_s3 + $0x38] sm:$0xff]  }
 0x95d   : > { %v1714_v39 = vpop.f32.mrb[14].mxu0 }
 0x95e   : > { %v4003_v40 = vadd.f32 %v1712_v38, %v3837_v2  ;;  %v1715_v42 = vadd.f32 %v2605_v37, %v1714_v39  ;;  %v2823_v43 = vpop.f32.mrb[15].mxu0  ;;  %v3079_v37 = vld [vmem:[%s3786_s3 + $0x78] sm:$0xff]   ;;  %v1779_v38 = vlaneseq }
 0x95f   : > { %2716 = vmatprep.subr.bf16.mxu0 %v3079_v37 }
 0x960   : > { %v4006_v45 = vadd.f32 %v1715_v42, %v3839_v3  ;;  %1722 = vadd.xlane.f32.xlu0 %v4003_v40  ;;  %2717 = vmatpush3.bf16.msra.mxu0 %v3080_v44  ;;  %v1780_v41 = vshrl.u32 %v1779_v38, 7  ;;  %v1777_v42 = vld [vmem:[%s3830_s23] sm:$0x3] }
 0x962   : > { %1724 = vadd.xlane.f32.xlu1 %v4006_v45  ;;  %v1781_v39 = vsub.s32 0, %v1780_v41  ;;  %v1785_v43 = vsub.s32 1, %v1780_v41 }
 0x964   : > { %v1782_v46 = vrot.slane %v1777_v42, %v1781_v39  ;;  %v1786_v63 = vrot.slane %v1777_v42, %v1785_v43  ;;  %v3129_v39 = vld [vmem:[%s4257_s7] sm:$0xff] (!%p2649_p1)   ;;  %v3411_v42 = vmov (!%p2649_p1), 0.0   ;;  %v3132_v43 = vld [vmem:[%s4257_s7 + $0x18] sm:$0xff] (!%p2649_p1)  }
 0x965   : > { %2824 = vmatprep.subr.bf16.mxu0 (!%p2649_p1), %v3411_v42  ;;  %2844 = vmatprep.subr.bf16.mxu1 (!%p2649_p1), %v3411_v42 }
 0x9ed   : > { %v1723_v2 = vpop.xlane.xlu0 %1722 }
 0x9ee   : > { %v1726_v49 = vmul.f32 0.0078125, %v1723_v2 }
 0x9ef   : > { %v1725_v3 = vpop.xlane.xlu1 %1724 }
 0x9f0   : > { %v1728_v50 = vsub.f32 %v4003_v40, %v1726_v49  ;;  %v1727_v51 = vmul.f32 0.0078125, %v1725_v3 }
 0x9f2   : > { %v1729_v52 = vsub.f32 %v4006_v45, %v1727_v51  ;;  %v1730_v53 = vmul.f32 %v1728_v50, %v1728_v50 }
 0x9f4   : > { %1732 = vadd.xlane.f32.xlu0 %v1730_v53  ;;  %v1731_v54 = vmul.f32 %v1729_v52, %v1729_v52 }
 0x9f8   : > { %1734 = vadd.xlane.f32.xlu0 %v1731_v54 }
 0xa81   : > { %v1733_v5 = vpop.xlane.xlu0 %1732 }
 0xa82   : > { %v1736_v7 = vmul.f32 0.0078125, %v1733_v5 }
 0xa84   : > { %v1738_v8 = vadd.f32 1e-05, %v1736_v7 }
 0xa85   : > { %v1735_v9 = vpop.xlane.xlu0 %1734 }
 0xa86   : > { %3117 = vrsqrt.f32 %v1738_v8  ;;  %v1737_v10 = vmul.f32 0.0078125, %v1735_v9 }
 0xa88   : > { %v1739_v11 = vadd.f32 1e-05, %v1737_v10 }
 0xa8a   : > { %3119 = vrsqrt.f32 %v1739_v11 }
 0xa90   : > { %v3118_v12 = vpop.eup %3117 }
 0xa91   : > { %v1742_v13 = vmul.f32 %v3118_v12, %v1728_v50 }
 0xa93   : > { %v1750_v17 = vmul.f32 %v2614_v14, %v1742_v13 }
 0xa94   : > { %v3120_v15 = vpop.eup %3119 }
 0xa95   : > { %v1743_v16 = vmul.f32 %v3120_v15, %v1729_v52  ;;  %v1758_v20 = vadd.f32 %v2615_v18, %v1750_v17 }
 0xa97   : > { %v1751_v19 = vmul.f32 %v2614_v14, %v1743_v16 }
 0xa99   : > { %v1759_v21 = vadd.f32 %v2615_v18, %v1751_v19 }
 0xa9b   : > { %v1760_v22 = vpack.c.bf16 %v1759_v21, %v1758_v20 }
 0xa9d   : > { %1902 = vmatmul.mubr.bf16.vlgmr.msra.gmra.mrb[28].mxu1 %v1760_v22 }
 0xa9e   : > { %2848 = vmatprep.mubr.msk.bf16.mxu1 (!%p2649_p1), %vm3412_vm5, %v3411_v42 }
 0xb70   : > { %v1903_v47 = vpop.f32.mrb[28].mxu1 }
 0xb71   : > { %v1904_v48 = vadd.f32 %v1903_v47, %v1782_v46  ;;  %v1905_v2 = vpop.f32.mrb[29].mxu1  ;;  %v3135_v47 = vld [vmem:[%s4257_s7 + $0x30] sm:$0xff] (!%p2649_p1)  }
 0xb72   : > { %v1906_v49 = vadd.f32 %v1905_v2, %v1786_v63  ;;  %v1907_v3 = vpop.f32.mrb[30].mxu1 }
 0xb73   : > { %v1912_v50 = vmul.f32 %v1904_v48, %v1904_v48  ;;  %v1908_v51 = vadd.f32 %v1907_v3, %v1782_v46  ;;  %v1909_v52 = vpop.f32.mrb[31].mxu1  ;;  %v3133_v46 = vld [vmem:[%s4257_s7 + $0x20] sm:$0xff] (!%p2649_p1)   ;;  %v3138_v3 = vld [vmem:[%s4259_s13 + $0x8] sm:$0xff] (!%p2649_p1)  }
 0xb74   : > { %v1913_v53 = vmul.f32 %v1906_v49, %v1906_v49  ;;  %v1910_v54 = vadd.f32 %v1909_v52, %v1786_v63  ;;  %v3134_v63 = vld [vmem:[%s4257_s7 + $0x28] sm:$0xff] (!%p2649_p1)  }
 0xb75   : > { %v1916_v55 = vmul.f32 %v1912_v50, %v1904_v48  ;;  %v1914_v56 = vmul.f32 %v1908_v51, %v1908_v51  ;;  %v2151_v50 = vld [vmem:[%s4260_s19] sm:$0x1] (!%p2649_p1) }
 0xb76   : > { %v1917_v57 = vmul.f32 %v1913_v53, %v1906_v49  ;;  %v1915_v58 = vmul.f32 %v1910_v54, %v1910_v54 }
 0xb77   : > { %v1920_v59 = vmul.f32 0.044715, %v1916_v55  ;;  %v1918_v60 = vmul.f32 %v1914_v56, %v1908_v51 }
 0xb78   : > { %v1921_v61 = vmul.f32 0.044715, %v1917_v57  ;;  %v1919_v62 = vmul.f32 %v1915_v58, %v1910_v54  ;;  %v2246_v58 = vld [vmem:[%s4261_s9] sm:$0x1] (!%p2649_p1) }
 0xb79   : > { %v1924_v0 = vadd.f32 %v1920_v59, %v1904_v48  ;;  %v1922_v32 = vmul.f32 0.044715, %v1918_v60 }
 0xb7a   : > { %v1925_v1 = vadd.f32 %v1921_v61, %v1906_v49  ;;  %v1923_v4 = vmul.f32 0.044715, %v1919_v62 }
 0xb7b   : > { %v1928_v5 = vmul.f32 0.7978846, %v1924_v0  ;;  %v1926_v7 = vadd.f32 %v1922_v32, %v1908_v51 }
 0xb7c   : > { %v1929_v8 = vmul.f32 0.7978846, %v1925_v1  ;;  %v1927_v9 = vadd.f32 %v1923_v4, %v1910_v54 }
 0xb7d   : > { %3121 = vtanh.f32 %v1928_v5  ;;  %v1930_v10 = vmul.f32 0.7978846, %v1926_v7 }
 0xb7e   : > { %3123 = vtanh.f32 %v1929_v8  ;;  %v1931_v11 = vmul.f32 0.7978846, %v1927_v9 }
 0xb7f   : > { %3125 = vtanh.f32 %v1930_v10 }
 0xb80   : > { %3127 = vtanh.f32 %v1931_v11 }
 0xb87   : > { %v3122_v12 = vpop.eup %3121 }
 0xb88   : > { %v3124_v13 = vpop.eup %3123  ;;  %v1936_v14 = vadd.f32 1.0, %v3122_v12 }
 0xb89   : > { %v3126_v15 = vpop.eup %3125  ;;  %v1937_v16 = vadd.f32 1.0, %v3124_v13 }
 0xb8a   : > { %v3128_v17 = vpop.eup %3127  ;;  %v1940_v18 = vmul.f32 0.5, %v1936_v14  ;;  %v1938_v19 = vadd.f32 1.0, %v3126_v15 }
 0xb8b   : > { %v1939_v20 = vadd.f32 1.0, %v3128_v17  ;;  %v1941_v21 = vmul.f32 0.5, %v1937_v16 }
 0xb8c   : > { %v1942_v22 = vmul.f32 0.5, %v1938_v19  ;;  %v1944_v24 = vmul.f32 %v1940_v18, %v1904_v48  ;;  %v3136_v48 = vld [vmem:[%s4257_s7 + $0x38] sm:$0xff] (!%p2649_p1)  }
 0xb8d   : > { %v1943_v23 = vmul.f32 0.5, %v1939_v20  ;;  %v1945_v25 = vmul.f32 %v1941_v21, %v1906_v49  ;;  %v3137_v49 = vld [vmem:[%s4258_s26] sm:$0xff] (!%p2649_p1)  }
 0xb8e   : > { %v1946_v6 = vmul.f32 %v1942_v22, %v1908_v51  ;;  %2845 = vmatpush3.bf16.msra.mxu1 (!%p2649_p1), %v3137_v49 }
 0xb8f   : > { %v1947_v26 = vmul.f32 %v1943_v23, %v1910_v54  ;;  %2846 = vmatprep.subr.bf16.mxu1 (!%p2649_p1), %v3411_v42 }
 0xb90   : > { %v1948_v27 = vpack.c.bf16 %v1946_v6, %v1944_v24 }
 0xb91   : > { %v1949_v28 = vpack.c.bf16 %v1947_v26, %v1945_v25 }
 0xb92   : > { %2847 = vmatpush3.bf16.msra.mxu1 (!%p2649_p1), %v3138_v3 }
 0xb93   : > { %2117 = vmatprep.mubr.bf16.mxu0 %v1949_v28 }
 0xb94   : > { %2118 = vmatmul.mubr.bf16.vlgmr.msra.gmra.mrb[16].mxu0 %v1948_v27 }
 0xb95   : > { %2825 = vmatpush3.bf16.msra.mxu0 (!%p2649_p1), %v3129_v39  ;;  %2840 = vmatprep.mubr.msk.bf16.mxu0 (!%p2649_p1), %vm3412_vm5, %v3411_v42 }
 0xb96   : > { %2826 = vmatprep.subr.bf16.mxu0 (!%p2649_p1), %v3411_v42 }
 0xc67   : > { %v2718_v29 = vpop.f32.mrb[16].mxu0 }
 0xc68   : > { %v2719_v31 = vpop.f32.mrb[17].mxu0 }
 0xc69   : > { %v2720_v33 = vadd.f32 %v2719_v31, %v2718_v29  ;;  %v2721_v34 = vpop.f32.mrb[18].mxu0 }
 0xc6a   : > { %v2722_v35 = vpop.f32.mrb[19].mxu0 }
 0xc6b   : > { %v2120_v36 = vadd.f32 %v2720_v33, %v2632_v30  ;;  %v2723_v37 = vadd.f32 %v2722_v35, %v2721_v34  ;;  %2133 = sbr.rel (%p2649_p1) target bundleno = 3956 (0xf74), region = 108 }
 0xc6d   : > { %v2126_v44 = vadd.f32 %v2120_v36, %v4003_v40  ;;  %v2123_v38 = vadd.f32 %v2723_v37, %v2632_v30  ;;  %v3130_v40 = vld [vmem:[%s4257_s7 + $0x8] sm:$0xff] (!%p2649_p1)  }
 0xc6e   : > { %2827 = vmatpush3.bf16.msra.mxu0 (!%p2649_p1), %v3130_v40 }
 0xc6f   : > { %2128 = vst [vmem:[#allocation2] sm:$0xff] %v2126_v44  ;;  %v2127_v41 = vadd.f32 %v2123_v38, %v4006_v45  ;;  %v3131_v45 = vld [vmem:[%s4257_s7 + $0x10] sm:$0xff] (!%p2649_p1)   ;;  %2828 = vmatprep.subr.bf16.mxu0 (!%p2649_p1), %v3411_v42  ;;  %v2134_v2 = vpack.c.bf16 (!%p2649_p1), %v2126_v44, %v2126_v44 }
 0xc71   : > { %2129 = vst [vmem:[#allocation2 + $0x8] sm:$0xff] %v2127_v41 }
 0xc72   : > { %2829 = vmatpush3.bf16.msra.mxu0 %v3131_v45 }
 0xc73   : > { %2830 = vmatprep.subr.bf16.mxu0 %v3411_v42 }
 0xc76   : > { %2831 = vmatpush3.bf16.msra.mxu0 %v3132_v43 }
 0xc77   : > { %2832 = vmatprep.subr.bf16.mxu0 %v3411_v42 }
 0xc7a   : > { %2833 = vmatpush3.bf16.msra.mxu0 %v3133_v46 }
 0xc7b   : > { %2834 = vmatprep.subr.bf16.mxu0 %v3411_v42 }
 0xc7e   : > { %2835 = vmatpush3.bf16.msra.mxu0 %v3134_v63 }
 0xc7f   : > { %2836 = vmatprep.subr.bf16.mxu0 %v3411_v42 }
 0xc82   : > { %2837 = vmatpush3.bf16.msra.mxu0 %v3135_v47 }
 0xc83   : > { %2838 = vmatprep.subr.bf16.mxu0 %v3411_v42 }
 0xc86   : > { %2839 = vmatpush3.bf16.msra.mxu0 %v3136_v48 }
 0xc89   : > { %2841 = vmatmul.mubr.bf16.vlgmr.msra.gmra.mrb[0].mxu0 %v2134_v2 }
 0xd5c   : > { %v2234_v51 = vpop.f32.mrb[0].mxu0 }
 0xd5d   : > { %v2235_v52 = vadd.f32 %v2234_v51, %v2151_v50  ;;  %v2842_v53 = vpop.f32.mrb[1].mxu0 }
 0xd5e   : > { %v2237_v54 = vpop.f32.mrb[2].mxu0 }
 0xd5f   : > { %v2240_v55 = vmax.f32 %v2235_v52, 0.0  ;;  %v2843_v56 = vpop.f32.mrb[3].mxu0 }
 0xd61   : > { %v2241_v57 = vpack.c.bf16 %v2240_v55, %v2240_v55 }
 0xd63   : > { %2849 = vmatmul.mubr.msk.bf16.vlgmr.msra.gmra.mrb[0].mxu1 %vm1091_vm1, %v2241_v57 }
 0xe36   : > { %v2296_v59 = vpop.f32.mrb[0].mxu1 }
 0xe37   : > { %v2297_v60 = vadd.f32 %v2296_v59, %v2246_v58  ;;  %v2850_v61 = vpop.f32.mrb[1].mxu1 }
 0xe38   : > { %v2299_v62 = vpop.f32.mrb[2].mxu1 }
 0xe39   : > { %v2851_v0 = vpop.f32.mrb[3].mxu1  ;;  %v2303_v32 = vsel %vm2302_vm6, %v2297_v60, -inf }
 0xe3a   : > { %2304 = vmax.xlane.f32.xlu0 %v2303_v32 }
 0xec7   : > { %v2305_v1 = vpop.xlane.xlu0 %2304 }
 0xec8   : > { %v2306_v4 = vsub.f32 %v2297_v60, %v2305_v1 }
 0xeca   : > { %v2307_v5 = vmul.f32 1.442695, %v2306_v4 }
 0xecc   : > { %3139 = vpow2.f32 %v2307_v5 }
 0xed6   : > { %v3140_v7 = vpop.eup %3139 }
 0xed7   : > { %v2309_v8 = vsel %vm2302_vm6, %v3140_v7, 0.0 }
 0xed8   : > { %2310 = vadd.xlane.f32.xlu0 %v2309_v8 }
 0xf65   : > { %v2311_v9 = vpop.xlane.xlu0 %2310 }
 0xf66   : > { %3141 = vrcp.f32 %v2311_v9 }
 0xf70   : > { %v3142_v10 = vpop.eup %3141 }
 0xf71   : > { %v2313_v11 = vmul.f32 %v3142_v10, %v3140_v7 }
 0xf73   : > { %2314 = vst.msk [vmem:[%s3834_s12] sm:$0x1] %vm2302_vm6, %v2313_v11 }
 0xf74 PF: > { %s4262_s8 = sld [smem:[#allocation20_spill]]  ;;  %s4263_s27 = sld [smem:[#allocation28_spill]] }
 0xf75   : > { %s4264_s29 = sld [smem:[#allocation42_spill]]  ;;  %s2328_s18 = sshll.u32 %s3834_s12, 4  ;;  %s2329_s18 = int_to_ptr.vmem [resolvable:$true] %s2328_s18 }
 0xf76   : > { %s4266_s21 = sand.u32 1, %s3357_s22   ;;  %s3263_s15 = scalar_lea.vmem %s2329_s18, 16 }
 0xf77   : > { %s2316_s11 = scalar_lea.sflag [#allocation5], %s4266_s21  ;;  %p3264_p2 = scmp.ne.s32.totalorder %s2329_s18, %s3263_s15 }
 0xf78   : > { %s3413_s17 = smov [#allocation11]  }
 0xf79   : > { %s3267_s24 = sshll.u32 %s3413_s17, 4  ;;  %s3268_s24 = int_to_ptr.vmem [resolvable:$false] %s3267_s24 }
 0xf7a   : > { %s2661_s10 = sshll.u32 %s4262_s8, 4  ;;  %p4267_p13 = scmp.ne.s32.totalorder %s4263_s27, 0 }
 0xf7b   : > { %s4265_s4 = smov %s4264_s29  ;;  %s4108_s30 = scalar_lea.hbm %s4264_s29, %s2661_s10 }
 0xf7c   : > { %p3265_p7 = pnand %p3264_p2, %p4267_p13  ;;  %s3269_s26 = scalar_lea.vmem %s3268_s24, 32 }
 0xf7d   : > { %p3270_p5 = scmp.lt.s32.totalorder %s2329_s18, %s3268_s24  ;;  %p3271_p11 = scmp.lt.s32.totalorder %s3269_s26, %s3263_s15 }
 0xf7e   : > { %p3266_p10 = pneg %p3265_p7 }
 0xf7f   : > { %p3272_p12 = por %p3271_p11, %p3270_p5 }
 0xf81   : > { %p3273_p3 = pnand %p3272_p12, %p3266_p10 }
 0xf83   : > { %3276 = shalt.err (!%p3273_p3)
}
 0xf84   : > { %s3277_s12 = scalar_lea.hbm %s4108_s30, 16  ;;  %s3281_s23 = scalar_lea.hbm %s4265_s4, 32 }
 0xf85   : > { %p3278_p6 = scmp.ne.s32.totalorder %s4108_s30, %s3277_s12  ;;  %p3282_p9 = scmp.lt.u32.totalorder %s4108_s30, %s4265_s4 }
 0xf86   : > { %p3283_p0 = scmp.lt.u32.totalorder %s3281_s23, %s3277_s12  ;;  %p3285_p2 = scmp.lt.u32.totalorder %s3277_s12, %s4108_s30 }
 0xf87   : > { %p3279_p8 = pnand %p3278_p6, %p4267_p13 }
 0xf88   : > { %p3284_p1 = por %p3283_p0, %p3282_p9 }
 0xf89   : > { %p3280_p4 = pneg %p3279_p8 }
 0xf8a   : > { %p3286_p7 = por %p3285_p2, %p3284_p1 }
 0xf8c   : > { %p3287_p10 = pnand %p3286_p7, %p3280_p4 }
 0xf8e   : > { %3290 = shalt.err (!%p3287_p10)
}
 0xf8f   : > { %2863 = dma.vmem_to_hbm [thread:$0]  (%p4267_p13), %s2329_s18, 16, %s4108_s30, %s2316_s11  }
 0xf90 PF: > { %s4268_s16 = sld [smem:[#allocation23_spill]]  ;;  %s4269_s0 = sld [smem:[#allocation16_spill]] }
 0xf91   : > { %s4270_s9 = sld [smem:[#allocation29_spill]] }
 0xf96   : > { %p2883_p5 = scmp.ge.s32.totalorder %s4268_s16, 2  ;;  %s2340_s8 = sand.u32 1, %s4269_s0  }
 0xf97   : > { %p4271_p11 = scmp.ne.s32.totalorder %s4270_s9, 0  ;;  %s2341_s10 = scalar_lea.sflag [#allocation5], %s2340_s8 }
 0xf99   : > { %p2879_p12 = pnand %p2883_p5, %p4271_p11 }
 0xf9b   : > { %3348 = dma.done.wait (!%p2879_p12), %s2341_s10, 16  }
 0xf9c   : > { %3350 = vsyncadd (!%p2879_p12), %s2341_s10, 4294967280  ;;  %s38_s0 = sadd.s32 1, %s4268_s16   ;;  %s4272_s25 = sld [smem:[#allocation17_spill]] }
 0xf9d   : > { %p35_p3 = scmp.ge.s32.totalorder %s38_s0, 6   ;;  %s4273_s23 = sld [smem:[#allocation27_spill]] }
 0xf9e   : > { %s4274_s24 = sld [smem:[#allocation18_spill]]  ;;  %s4275_s27 = sld [smem:[#allocation19_spill]] }
 0xf9f   : > { %s4276_s26 = sld [smem:[#allocation26_spill]]  ;;  %s4277_s28 = sld [smem:[#allocation21_spill]] }
 0xfa0   : > { %s4278_s29 = sld [smem:[#allocation22_spill]]  ;;  %s4279_s30 = sld [smem:[#allocation24_spill]] }
 0xfa1   : > { %s4280_s18 = sld [smem:[#allocation25_spill]]  ;;  %s4281_s21 = smov %s3357_s22 }
 0xfa2   : > { %s4282_s22 = smov %s4272_s25  ;;  %37 = sbr.rel (!%p35_p3) target bundleno = 27 (0x1b), region = 198 }
 0xfa4   : > { %s4283_s25 = smov %s4275_s27 }
 0xfa5   : > { %s4284_s27 = smov %s4277_s28 }
 0xfa6   : > { %s4285_s28 = smov %s4278_s29  ;;  %s4286_s29 = smov %s4279_s30 }
 0xfa7   : > { %s4287_s30 = smov %s4280_s18 }
 0xfa9   :  { %2345 = vsyncpa [#allocation4], 1 }
 0xfaa   :  { %2347 = vsyncpa [#allocation4 + $0x1], 1 }
 0xfab   :  { %2348 = vsyncpa [#allocation7], 1 }
 0xfac   :  { %2350 = vsyncpa [#allocation7 + $0x1], 1 }
 0xfad   :  { %2351 = vsyncpa [#allocation10], 1 }
 0xfae   :  { %2353 = vsyncpa [#allocation10 + $0x1], 1 }
 0xfaf   :  { %2354 = vsyncpa [#allocation5], 1 }
 0xfb0   :  { %2356 = vsyncpa [#allocation5 + $0x1], 1 }

</bundles_post_ra>
